<compile_context>
chip_gen: v5e
topology: v5e:2x2
jax: 0.10.0
libtpu: 0.0.40
codegen_flags: <defaults>
</compile_context>

<pallas_src>
import jax
import jax.numpy as jnp
from jax.experimental import pallas as pl
from jax.experimental.pallas import tpu as pltpu


def _round_up(x, m):
    return ((x + m - 1) // m) * m


# ---------------------------------------------------------------------------
# Hardware heuristics: per-generation token-tile target and VMEM budget.
# ---------------------------------------------------------------------------
def _tpu_config():
    vmem_bytes = 64 * 1024 * 1024
    try:
        info = pltpu.get_tpu_info()
        vmem_bytes = int(getattr(info, "vmem_capacity_bytes", vmem_bytes))
    except Exception:
        pass
    kind = ""
    try:
        kind = jax.devices()[0].device_kind.lower()
    except Exception:
        pass
    if "v5 lite" in kind or "v5e" in kind or "v5lite" in kind:
        target_tt = 384        # v5e: compute-ratio limited early; modest tiles
    elif "v6" in kind:
        target_tt = 1024       # v6e: big token tiles to amortize weight DMA
    elif "v7" in kind:
        target_tt = 512        # v7x: 3.2 TB/s HBM, but only 64 MiB VMEM
    else:
        target_tt = 512
    budget = int(vmem_bytes * 0.85)   # ~108 MiB on v5e/v6e, ~54 MiB on v7x
    return target_tt, budget


def _expert_vmem_footprint(tT, tI, H, itemsize):
    return (2 * tT * H * itemsize          # x block (double-buffered)
            + 2 * tT * H * itemsize        # output block (double-buffered)
            + 2 * tT * 4                   # routing-weight column
            + 2 * 3 * H * tI * itemsize    # wg/wu/wd chunks, double-buffered
            + tT * H * 4                   # f32 accumulator scratch
            + tT * H * 4                   # f32 down-proj temporary
            + 3 * tT * tI * 4)             # g / u / h intermediates


def _pick_i_chunk(I, max_chunk):
    """Largest 128-multiple chunk <= max_chunk that divides padded I."""
    I128 = _round_up(I, 128)
    max_chunk = max(128, (max_chunk // 128) * 128)
    if I128 <= max_chunk:
        return I128, I128
    c = max_chunk
    while c > 128 and I128 % c != 0:
        c -= 128
    return c, I128


# ---------------------------------------------------------------------------
# Kernel 1: router gate  (x @ W_gate^T -> logits), bf16 MXU, f32 accumulate
# ---------------------------------------------------------------------------
def gate_kernel(x_ref, wt_ref, o_ref):
    o_ref[...] = jnp.dot(x_ref[...], wt_ref[...],
                         preferred_element_type=jnp.float32)


# ---------------------------------------------------------------------------
# Kernel 2: fused MoE experts (SwiGLU MLP, I-chunked, weighted accumulation)
# ---------------------------------------------------------------------------
def moe_expert_kernel(na_ref, eid_ref, x_ref, rw_ref, wg_ref, wu_ref, wd_ref,
                      o_ref, acc_ref):
    del eid_ref  # only consumed by the weight / routing index_maps
    i = pl.program_id(1)   # I-chunk
    e = pl.program_id(2)   # compacted expert slot (innermost)

    @pl.when((i == 0) & (e == 0))
    def _():
        acc_ref[...] = jnp.zeros_like(acc_ref)

    # Skip all compute for padded (inactive) expert slots.
    @pl.when(e < na_ref[0])
    def _():
        x = x_ref[...]                                                 # (tT, H)
        g = jnp.dot(x, wg_ref[0], preferred_element_type=jnp.float32)  # (tT, tI)
        u = jnp.dot(x, wu_ref[0], preferred_element_type=jnp.float32)  # (tT, tI)
        # SiLU(g) * u with the routing weight folded in over the intermediate
        # dim (cheaper than a (tT, H) multiply after the down projection).
        h = (g * jax.nn.sigmoid(g)) * u * rw_ref[0]
        acc_ref[...] += jnp.dot(h.astype(x.dtype), wd_ref[0],
                                preferred_element_type=jnp.float32)    # (tT, H)

    # Write the output tile only once, on the final (chunk, expert) step.
    @pl.when((i == pl.num_programs(1) - 1) & (e == pl.num_programs(2) - 1))
    def _():
        o_ref[...] = acc_ref[...].astype(o_ref.dtype)


# ---------------------------------------------------------------------------
# Wrapper: reshapes, routing glue, pallas_call setup
# ---------------------------------------------------------------------------
def qwen3_moe_forward(hidden_states, gate_w, w_gate, w_up, w_down, top_k,
                      tile_tokens=None, max_i_chunk=512):
    orig_shape = hidden_states.shape
    H = orig_shape[-1]
    x = hidden_states.reshape(-1, H)
    T = x.shape[0]
    E, _, I = w_gate.shape
    dtype = x.dtype
    itemsize = jnp.dtype(dtype).itemsize

    # ---- tile selection (generation-aware) ----
    target_tt, budget = _tpu_config()
    if tile_tokens is not None:
        target_tt = _round_up(int(tile_tokens), 8)
    tT = min(target_tt, _round_up(T, 8))

    tI, I_pad = _pick_i_chunk(I, max_i_chunk)
    while _expert_vmem_footprint(tT, tI, H, itemsize) > budget:
        if tI > 128:
            tI, I_pad = _pick_i_chunk(I, tI - 128)
        elif tT > 8:
            tT = max(8, (tT // 2) // 8 * 8)
        else:
            break
    n_i = I_pad // tI
    Tp = _round_up(T, tT)
    n_t = Tp // tT

    fp = _expert_vmem_footprint(tT, tI, H, itemsize)
    # Never clamp below the real per-step footprint (fail loudly instead).
    vmem_limit = int(budget if fp <= budget else fp + (8 << 20))

    x_p = jnp.pad(x, ((0, Tp - T), (0, 0)))

    # ---- 1) router logits (Pallas, bf16 MXU, f32 accumulate, E -> 128) ----
    Ep = _round_up(E, 128)
    gate_wt = jnp.pad(gate_w.T, ((0, 0), (0, Ep - E)))   # model dtype
    logits = pl.pallas_call(
        gate_kernel,
        out_shape=jax.ShapeDtypeStruct((Tp, Ep), jnp.float32),
        grid=(n_t,),
        in_specs=[
            pl.BlockSpec((tT, H), lambda t: (t, 0)),
            pl.BlockSpec((H, Ep), lambda t: (0, 0)),
        ],
        out_specs=pl.BlockSpec((tT, Ep), lambda t: (t, 0)),
        compiler_params=pltpu.CompilerParams(
            dimension_semantics=("parallel",),
            vmem_limit_bytes=vmem_limit),
    )(x_p, gate_wt)[:T, :E]

    # ---- 2) Renormalize routing (top-k, softmax over selection) ----
    top_vals, top_idx = jax.lax.top_k(logits, top_k)
    top_w = jax.nn.softmax(top_vals, axis=-1)                     # (T, k) f32
    # Dense (T, E) routing weights via scatter-add (no (T,k,E) one-hot).
    route_w = jnp.zeros((T, E), jnp.float32).at[
        jnp.arange(T)[:, None], top_idx].add(top_w)
    # Compacted active-expert list (static length = min(E, T*top_k)).
    counts = jnp.zeros((E,), jnp.int32).at[top_idx.reshape(-1)].add(1)
    active = counts > 0
    num_active = jnp.sum(active.astype(jnp.int32))
    order = jnp.argsort(jnp.where(active, jnp.arange(E, dtype=jnp.int32),
                                  jnp.int32(E)))
    E_grid = min(E, T * top_k)
    last_active = order[jnp.maximum(num_active - 1, 0)]
    eid = jnp.where(jnp.arange(E_grid, dtype=jnp.int32) < num_active,
                    order[:E_grid].astype(jnp.int32),
                    last_active).astype(jnp.int32)
    na = num_active.reshape(1).astype(jnp.int32)
    # Pre-transposed, token-padded routing columns: (E, Tp, 1).
    route_w_t = jnp.pad(route_w, ((0, Tp - T), (0, 0))).T[:, :, None]

    # Pad intermediate dim if needed (zero columns/rows contribute nothing).
    if I_pad != I:
        w_gate = jnp.pad(w_gate, ((0, 0), (0, 0), (0, I_pad - I)))
        w_up = jnp.pad(w_up, ((0, 0), (0, 0), (0, I_pad - I)))
        w_down = jnp.pad(w_down, ((0, 0), (0, I_pad - I), (0, 0)))

    # ---- 3) fused experts: grid = (token tiles, I chunks, active experts) ----
    out_p = pl.pallas_call(
        moe_expert_kernel,
        out_shape=jax.ShapeDtypeStruct((Tp, H), dtype),
        grid_spec=pltpu.PrefetchScalarGridSpec(
            num_scalar_prefetch=2,
            grid=(n_t, n_i, E_grid),   # experts innermost: padded slots repeat
                                       # the previous block index -> DMA elided
            in_specs=[
                pl.BlockSpec((tT, H), lambda t, i, e, na, eid: (t, 0)),
                pl.BlockSpec((1, tT, 1),
                             lambda t, i, e, na, eid: (eid[e], t, 0)),
                pl.BlockSpec((1, H, tI),
                             lambda t, i, e, na, eid: (eid[e], 0, i)),
                pl.BlockSpec((1, H, tI),
                             lambda t, i, e, na, eid: (eid[e], 0, i)),
                pl.BlockSpec((1, tI, H),
                             lambda t, i, e, na, eid: (eid[e], i, 0)),
            ],
            out_specs=pl.BlockSpec((tT, H), lambda t, i, e, na, eid: (t, 0)),
            scratch_shapes=[pltpu.VMEM((tT, H), jnp.float32)],
        ),
        compiler_params=pltpu.CompilerParams(
            dimension_semantics=("parallel", "arbitrary", "arbitrary"),
            vmem_limit_bytes=vmem_limit),
    )(na, eid, x_p, route_w_t, w_gate, w_up, w_down)

    out = out_p[:T]
    # TODO(synk): AllReduce (tp_size > 1) is identity on a single device.
    return out.reshape(orig_shape)


# ---------------------------------------------------------------------------
# Pure-JAX reference (model-dtype matmuls, f32 accumulation, f32 router)
# ---------------------------------------------------------------------------
def reference_forward(hidden_states, gate_w, w_gate, w_up, w_down, top_k):
    orig_shape = hidden_states.shape
    H = orig_shape[-1]
    dtype = hidden_states.dtype
    x = hidden_states.reshape(-1, H)
    logits = x.astype(jnp.float32) @ gate_w.astype(jnp.float32).T
    top_vals, top_idx = jax.lax.top_k(logits, top_k)
    top_w = jax.nn.softmax(top_vals, axis=-1)
    T, E = logits.shape
    route_w = jnp.zeros((T, E), jnp.float32).at[
        jnp.arange(T)[:, None], top_idx].add(top_w)
    out = jnp.zeros((T, H), jnp.float32)
    for e in range(E):
        g = jnp.dot(x, w_gate[e], preferred_element_type=jnp.float32)
        u = jnp.dot(x, w_up[e], preferred_element_type=jnp.float32)
        h = ((g * jax.nn.sigmoid(g)) * u).astype(dtype)
        d = jnp.dot(h, w_down[e], preferred_element_type=jnp.float32)
        out = out + route_w[:, e:e + 1] * d
    return out.astype(dtype).reshape(orig_shape)


if __name__ == "__main__":
    def run_case(name, batch, seq, hidden, inter, n_exp, top_k, dtype,
                 tile_tokens=None, max_i_chunk=512):
        key = jax.random.PRNGKey(0)
        k0, k1, k2, k3, k4, k5, k6 = jax.random.split(key, 7)
        T = batch * seq
        gate_w_f32 = jax.random.normal(k1, (n_exp, hidden), jnp.float32)
        gate_w_f32 = gate_w_f32 / jnp.sqrt(jnp.float32(hidden))
        # Each token strongly prefers two distinct experts so bf16-vs-f32
        # router rounding cannot flip the top-k selection in this test.
        p1 = jax.random.randint(k5, (T,), 0, n_exp)
        p2 = (p1 + 1 + jax.random.randint(k6, (T,), 0, n_exp - 1)) % n_exp
        hs = (0.3 * jax.random.normal(k0, (T, hidden), jnp.float32)
              + 3.0 * gate_w_f32[p1] + 2.0 * gate_w_f32[p2])
        hs = hs.reshape(batch, seq, hidden).astype(dtype)
        gate_w = gate_w_f32.astype(dtype)
        w_gate = (0.08 * jax.random.normal(k2, (n_exp, hidden, inter),
                                           jnp.float32)).astype(dtype)
        w_up = (0.08 * jax.random.normal(k3, (n_exp, hidden, inter),
                                         jnp.float32)).astype(dtype)
        w_down = (0.08 * jax.random.normal(k4, (n_exp, inter, hidden),
                                           jnp.float32)).astype(dtype)

        fwd = jax.jit(qwen3_moe_forward,
                      static_argnames=("top_k", "tile_tokens", "max_i_chunk"))
        out = jax.block_until_ready(
            fwd(hs, gate_w, w_gate, w_up, w_down, top_k=top_k,
                tile_tokens=tile_tokens, max_i_chunk=max_i_chunk))
        ref = reference_forward(hs, gate_w, w_gate, w_up, w_down, top_k)
        assert out.shape == hs.shape, (name, out.shape, hs.shape)
        o32 = out.astype(jnp.float32)
        r32 = ref.astype(jnp.float32)
        rel = float(jnp.max(jnp.abs(o32 - r32) / (1.0 + jnp.abs(r32))))
        assert rel < 2.5e-2, (name, rel)

    # Prefill-like: multiple token tiles + multiple I-chunks, experts all active.
    run_case("prefill", batch=2, seq=64, hidden=256, inter=256,
             n_exp=8, top_k=2, dtype=jnp.bfloat16,
             tile_tokens=64, max_i_chunk=128)
    # Decode-like: few tokens -> compacted expert grid with padded inactive slots.
    run_case("decode", batch=4, seq=1, hidden=256, inter=256,
             n_exp=16, top_k=2, dtype=jnp.bfloat16)

    print("KERNEL_OK")
</pallas_src>

<mosaic_0001>
module attributes {stable_mosaic.version = 11 : i64} {
  func.func @gate_kernel(%arg0: i32, %arg1: memref<64x256xbf16, #tpu.memory_space<vmem>>, %arg2: memref<256x128xbf16, #tpu.memory_space<vmem>>, %arg3: memref<64x128xf32, #tpu.memory_space<vmem>>) attributes {dimension_semantics = [#tpu.dimension_semantics<parallel>], iteration_bounds = array<i64: 2>, scalar_prefetch = 0 : i64, scratch_operands = 0 : i64, tpu.core_type = #tpu.core_type<tc>, window_params = [{transform_indices = @transform_0, window_bounds = array<i64: 64, 256>}, {pipeline_mode = #tpu.pipeline_mode<synchronous>, transform_indices = @transform_1, window_bounds = array<i64: 256, 128>}, {transform_indices = @transform_2, window_bounds = array<i64: 64, 128>}]} {
    %c0 = arith.constant 0 : index
    %c0_0 = arith.constant 0 : index
    %0 = vector.load %arg1[%c0, %c0_0] : memref<64x256xbf16, #tpu.memory_space<vmem>>, vector<64x256xbf16>
    %c0_1 = arith.constant 0 : index
    %c0_2 = arith.constant 0 : index
    %1 = vector.load %arg2[%c0_1, %c0_2] : memref<256x128xbf16, #tpu.memory_space<vmem>>, vector<256x128xbf16>
    %cst = arith.constant dense<0.000000e+00> : vector<64x128xf32>
    %2 = tpu.matmul %0, %1, %cst {dimension_numbers = #tpu.dot_dimension_numbers<[1], [0], [0], [1], [0, 0, 1, 1], [], []>} : vector<64x256xbf16>, vector<256x128xbf16>, vector<64x128xf32> -> vector<64x128xf32>
    %c0_3 = arith.constant 0 : index
    %c0_4 = arith.constant 0 : index
    %3 = vector.load %arg3[%c0_3, %c0_4] : memref<64x128xf32, #tpu.memory_space<vmem>>, vector<64x128xf32>
    tpu.vector_store %arg3[%c0_3, %c0_4], %2 {strides = array<i32>} : memref<64x128xf32, #tpu.memory_space<vmem>>, vector<64x128xf32>,
    return
  }
  func.func @transform_0(%arg0: i32) -> (i32, i32) {
    %c0_i32 = arith.constant 0 : i32
    %c0_i32_0 = arith.constant 0 : i32
    return %arg0, %c0_i32 : i32, i32
  }
  func.func @transform_1(%arg0: i32) -> (i32, i32) {
    %c0_i32 = arith.constant 0 : i32
    %c0_i32_0 = arith.constant 0 : i32
    %c0_i32_1 = arith.constant 0 : i32
    return %c0_i32, %c0_i32_0 : i32, i32
  }
  func.func @transform_2(%arg0: i32) -> (i32, i32) {
    %c0_i32 = arith.constant 0 : i32
    %c0_i32_0 = arith.constant 0 : i32
    return %arg0, %c0_i32 : i32, i32
  }
}

module attributes {stable_mosaic.version = 11 : i64} {
  func.func @moe_expert_kernel(%arg0: i32, %arg1: i32, %arg2: i32, %arg3: memref<1xi32, #tpu.memory_space<smem>>, %arg4: memref<8xi32, #tpu.memory_space<smem>>, %arg5: memref<64x256xbf16, #tpu.memory_space<vmem>>, %arg6: memref<1x64x1xf32, #tpu.memory_space<vmem>>, %arg7: memref<1x256x128xbf16, #tpu.memory_space<vmem>>, %arg8: memref<1x256x128xbf16, #tpu.memory_space<vmem>>, %arg9: memref<1x128x256xbf16, #tpu.memory_space<vmem>>, %arg10: memref<64x256xbf16, #tpu.memory_space<vmem>>, %arg11: memref<64x256xf32, #tpu.memory_space<vmem>>) attributes {dimension_semantics = [#tpu.dimension_semantics<parallel>, #tpu.dimension_semantics<arbitrary>, #tpu.dimension_semantics<arbitrary>], iteration_bounds = array<i64: 2, 2, 8>, scalar_prefetch = 2 : i64, scratch_operands = 1 : i64, tpu.core_type = #tpu.core_type<tc>, window_params = [{transform_indices = @transform_0, window_bounds = array<i64: 64, 256>}, {transform_indices = @transform_1, window_bounds = array<i64: 1, 64, 1>}, {transform_indices = @transform_2, window_bounds = array<i64: 1, 256, 128>}, {transform_indices = @transform_3, window_bounds = array<i64: 1, 256, 128>}, {transform_indices = @transform_4, window_bounds = array<i64: 1, 128, 256>}, {transform_indices = @transform_5, window_bounds = array<i64: 64, 256>}]} {
    %c0_i32 = arith.constant 0 : i32
    %0 = arith.cmpi eq, %arg1, %c0_i32 : i32
    %c0_i32_0 = arith.constant 0 : i32
    %1 = arith.cmpi eq, %arg2, %c0_i32_0 : i32
    %2 = arith.andi %0, %1 : i1
    %3 = arith.extui %2 : i1 to i32
    %c0_i32_1 = arith.constant 0 : i32
    %4 = arith.cmpi ne, %3, %c0_i32_1 : i32
    scf.if %4 {
      %cst = arith.constant 0.000000e+00 : f32
      %14 = vector.broadcast %cst : f32 to vector<64x256xf32>
      %c0_4 = arith.constant 0 : index
      %c0_5 = arith.constant 0 : index
      %15 = vector.load %arg11[%c0_4, %c0_5] : memref<64x256xf32, #tpu.memory_space<vmem>>, vector<64x256xf32>
      tpu.vector_store %arg11[%c0_4, %c0_5], %14 {strides = array<i32>} : memref<64x256xf32, #tpu.memory_space<vmem>>, vector<64x256xf32>,
    } else {
    }
    %c0 = arith.constant 0 : index
    %5 = memref.load %arg3[%c0] : memref<1xi32, #tpu.memory_space<smem>>
    %6 = arith.cmpi slt, %arg2, %5 : i32
    %7 = arith.extui %6 : i1 to i32
    %c0_i32_2 = arith.constant 0 : i32
    %8 = arith.cmpi ne, %7, %c0_i32_2 : i32
    scf.if %8 {
      %c0_4 = arith.constant 0 : index
      %c0_5 = arith.constant 0 : index
      %14 = vector.load %arg5[%c0_4, %c0_5] : memref<64x256xbf16, #tpu.memory_space<vmem>>, vector<64x256xbf16>
      %c0_6 = arith.constant 0 : index
      %c0_7 = arith.constant 0 : index
      %c0_8 = arith.constant 0 : index
      %15 = vector.load %arg7[%c0_6, %c0_7, %c0_8] : memref<1x256x128xbf16, #tpu.memory_space<vmem>>, vector<1x256x128xbf16>
      %16 = vector.shape_cast %15 : vector<1x256x128xbf16> to vector<256x128xbf16>
      %cst = arith.constant dense<0.000000e+00> : vector<64x128xf32>
      %17 = tpu.matmul %14, %16, %cst {dimension_numbers = #tpu.dot_dimension_numbers<[1], [0], [0], [1], [0, 0, 1, 1], [], []>} : vector<64x256xbf16>, vector<256x128xbf16>, vector<64x128xf32> -> vector<64x128xf32>
      %c0_9 = arith.constant 0 : index
      %c0_10 = arith.constant 0 : index
      %c0_11 = arith.constant 0 : index
      %18 = vector.load %arg8[%c0_9, %c0_10, %c0_11] : memref<1x256x128xbf16, #tpu.memory_space<vmem>>, vector<1x256x128xbf16>
      %19 = vector.shape_cast %18 : vector<1x256x128xbf16> to vector<256x128xbf16>
      %cst_12 = arith.constant dense<0.000000e+00> : vector<64x128xf32>
      %20 = tpu.matmul %14, %19, %cst_12 {dimension_numbers = #tpu.dot_dimension_numbers<[1], [0], [0], [1], [0, 0, 1, 1], [], []>} : vector<64x256xbf16>, vector<256x128xbf16>, vector<64x128xf32> -> vector<64x128xf32>
      %21 = arith.negf %17 : vector<64x128xf32>
      %22 = math.exp %21 : vector<64x128xf32>
      %cst_13 = arith.constant 1.000000e+00 : f32
      %23 = vector.broadcast %cst_13 : f32 to vector<64x128xf32>
      %24 = arith.addf %23, %22 : vector<64x128xf32>
      %25 = arith.divf %23, %24 : vector<64x128xf32>
      %26 = arith.mulf %17, %25 : vector<64x128xf32>
      %27 = arith.mulf %26, %20 : vector<64x128xf32>
      %c0_14 = arith.constant 0 : index
      %c0_15 = arith.constant 0 : index
      %c0_16 = arith.constant 0 : index
      %28 = vector.load %arg6[%c0_14, %c0_15, %c0_16] : memref<1x64x1xf32, #tpu.memory_space<vmem>>, vector<1x64x1xf32>
      %29 = vector.shape_cast %28 : vector<1x64x1xf32> to vector<64x1xf32>
      %30 = vector.broadcast %29 : vector<64x1xf32> to vector<64x128xf32>
      %31 = arith.mulf %27, %30 : vector<64x128xf32>
      %c0_17 = arith.constant 0 : index
      %c0_18 = arith.constant 0 : index
      %32 = vector.load %arg11[%c0_17, %c0_18] : memref<64x256xf32, #tpu.memory_space<vmem>>, vector<64x256xf32>
      %33 = arith.truncf %31 : vector<64x128xf32> to vector<64x128xbf16>
      %c0_19 = arith.constant 0 : index
      %c0_20 = arith.constant 0 : index
      %c0_21 = arith.constant 0 : index
      %34 = vector.load %arg9[%c0_19, %c0_20, %c0_21] : memref<1x128x256xbf16, #tpu.memory_space<vmem>>, vector<1x128x256xbf16>
      %35 = vector.shape_cast %34 : vector<1x128x256xbf16> to vector<128x256xbf16>
      %cst_22 = arith.constant dense<0.000000e+00> : vector<64x256xf32>
      %36 = tpu.matmul %33, %35, %cst_22 {dimension_numbers = #tpu.dot_dimension_numbers<[1], [0], [0], [1], [0, 0, 1, 1], [], []>} : vector<64x128xbf16>, vector<128x256xbf16>, vector<64x256xf32> -> vector<64x256xf32>
      %37 = arith.addf %32, %36 : vector<64x256xf32>
      %c0_23 = arith.constant 0 : index
      %c0_24 = arith.constant 0 : index
      %38 = vector.load %arg11[%c0_23, %c0_24] : memref<64x256xf32, #tpu.memory_space<vmem>>, vector<64x256xf32>
      tpu.vector_store %arg11[%c0_23, %c0_24], %37 {strides = array<i32>} : memref<64x256xf32, #tpu.memory_space<vmem>>, vector<64x256xf32>,
    } else {
    }
    %c1_i32 = arith.constant 1 : i32
    %9 = arith.cmpi eq, %arg1, %c1_i32 : i32
    %c7_i32 = arith.constant 7 : i32
    %10 = arith.cmpi eq, %arg2, %c7_i32 : i32
    %11 = arith.andi %9, %10 : i1
    %12 = arith.extui %11 : i1 to i32
    %c0_i32_3 = arith.constant 0 : i32
    %13 = arith.cmpi ne, %12, %c0_i32_3 : i32
    scf.if %13 {
      %c0_4 = arith.constant 0 : index
      %c0_5 = arith.constant 0 : index
      %14 = vector.load %arg11[%c0_4, %c0_5] : memref<64x256xf32, #tpu.memory_space<vmem>>, vector<64x256xf32>
      %15 = arith.truncf %14 : vector<64x256xf32> to vector<64x256xbf16>
      %c0_6 = arith.constant 0 : index
      %c0_7 = arith.constant 0 : index
      %16 = vector.load %arg10[%c0_6, %c0_7] : memref<64x256xbf16, #tpu.memory_space<vmem>>, vector<64x256xbf16>
      tpu.vector_store %arg10[%c0_6, %c0_7], %15 {strides = array<i32>} : memref<64x256xbf16, #tpu.memory_space<vmem>>, vector<64x256xbf16>,
    } else {
    }
    return
  }
  func.func @transform_0(%arg0: i32, %arg1: i32, %arg2: i32, %arg3: memref<1xi32, #tpu.memory_space<smem>>, %arg4: memref<8xi32, #tpu.memory_space<smem>>) -> (i32, i32) {
    %c0_i32 = arith.constant 0 : i32
    %c0_i32_0 = arith.constant 0 : i32
    return %arg0, %c0_i32 : i32, i32
  }
  func.func @transform_1(%arg0: i32, %arg1: i32, %arg2: i32, %arg3: memref<1xi32, #tpu.memory_space<smem>>, %arg4: memref<8xi32, #tpu.memory_space<smem>>) -> (i32, i32, i32) {
    %0 = arith.index_cast %arg2 : i32 to index
    %1 = memref.load %arg4[%0] : memref<8xi32, #tpu.memory_space<smem>>
    %c0_i32 = arith.constant 0 : i32
    %c0_i32_0 = arith.constant 0 : i32
    return %1, %arg0, %c0_i32 : i32, i32, i32
  }
  func.func @transform_2(%arg0: i32, %arg1: i32, %arg2: i32, %arg3: memref<1xi32, #tpu.memory_space<smem>>, %arg4: memref<8xi32, #tpu.memory_space<smem>>) -> (i32, i32, i32) {
    %0 = arith.index_cast %arg2 : i32 to index
    %1 = memref.load %arg4[%0] : memref<8xi32, #tpu.memory_space<smem>>
    %c0_i32 = arith.constant 0 : i32
    %c0_i32_0 = arith.constant 0 : i32
    return %1, %c0_i32, %arg1 : i32, i32, i32
  }
  func.func @transform_3(%arg0: i32, %arg1: i32, %arg2: i32, %arg3: memref<1xi32, #tpu.memory_space<smem>>, %arg4: memref<8xi32, #tpu.memory_space<smem>>) -> (i32, i32, i32) {
    %0 = arith.index_cast %arg2 : i32 to index
    %1 = memref.load %arg4[%0] : memref<8xi32, #tpu.memory_space<smem>>
    %c0_i32 = arith.constant 0 : i32
    %c0_i32_0 = arith.constant 0 : i32
    return %1, %c0_i32, %arg1 : i32, i32, i32
  }
  func.func @transform_4(%arg0: i32, %arg1: i32, %arg2: i32, %arg3: memref<1xi32, #tpu.memory_space<smem>>, %arg4: memref<8xi32, #tpu.memory_space<smem>>) -> (i32, i32, i32) {
    %0 = arith.index_cast %arg2 : i32 to index
    %1 = memref.load %arg4[%0] : memref<8xi32, #tpu.memory_space<smem>>
    %c0_i32 = arith.constant 0 : i32
    %c0_i32_0 = arith.constant 0 : i32
    return %1, %arg1, %c0_i32 : i32, i32, i32
  }
  func.func @transform_5(%arg0: i32, %arg1: i32, %arg2: i32, %arg3: memref<1xi32, #tpu.memory_space<smem>>, %arg4: memref<8xi32, #tpu.memory_space<smem>>) -> (i32, i32) {
    %c0_i32 = arith.constant 0 : i32
    %c0_i32_0 = arith.constant 0 : i32
    return %arg0, %c0_i32 : i32, i32
  }
}

</mosaic_0001>

<bundles_post_ra>
// kernel: qwen3_moe_forward.2
= control target key start
LH: loop header
LB: loop body
LE: loop exit
PB: predicated region body
PF: predicated region fallthrough
CT: control target
= control target key end

     0   :  { %s628_s9 = smov 0   ;;  %s728_s0 = inlined_call_operand.vmem [shape: bf16[128,256], index: 0, kind: input, shape index: {}]   ;;  %s729_s1 = inlined_call_operand.vmem [shape: bf16[256,128], index: 1, kind: input, shape index: {}]   ;;  %s730_s2 = inlined_call_operand.vmem [shape: f32[128,128], index: 2, kind: output, shape index: {}]  }
   0x1 LB: > { %s448_s10 = sadd.s32 4294967295, %s611_s9   ;;  %p452_p0 = scmp.ge.s32.totalorder %s611_s9, 1  ;;  %s611_s9 = sphi %s628_s9, %s12_s9  }
   0x2   : > { %p114_p1 = scmp.lt.s32.totalorder %s611_s9, 3 }
   0x4   : > { %p115_p2 = pnand %p452_p0, %p114_p1 }
   0x5   : > { %s453_s23 = sshll.u32 (!%p115_p2), %s448_s10, 3 }
   0x6   : > { %118 = sbr.rel (%p115_p2) target bundleno = 203 (0xcb), region = 28  ;;  %p138_p3 = scmp.lt.s32.totalorder (!%p115_p2), %s453_s23, 15 }
   0xb   : > { %v572_v0 = vld [vmem:[%s729_s1 + $0x38] sm:$0xff]  ;;  %v571_v2 = vld [vmem:[%s729_s1 + $0x30] sm:$0xff]  ;;  %v570_v4 = vld [vmem:[%s729_s1 + $0x28] sm:$0xff]  ;;  %s732_s23 = smov (!%p138_p3, %s453_s23), 15 }
   0xc   : > { %v580_v1 = vld [vmem:[%s729_s1 + $0x78] sm:$0xff]  ;;  %326 = vmatpush.bf16.msra.mxu0 %v572_v0  ;;  %581 = vmatpush.bf16.msra.mxu2 %v572_v0  ;;  %v579_v3 = vld [vmem:[%s729_s1 + $0x70] sm:$0xff]  ;;  %v578_v5 = vld [vmem:[%s729_s1 + $0x68] sm:$0xff]  ;;  %s556_s8 = sshll.u32 %s732_s23, 3 }
   0xd   : > { %355 = vmatpush.bf16.msra.mxu1 %v580_v1  ;;  %589 = vmatpush.bf16.msra.mxu3 %v580_v1  ;;  %v569_v6 = vld [vmem:[%s729_s1 + $0x20] sm:$0xff]  ;;  %v568_v8 = vld [vmem:[%s729_s1 + $0x18] sm:$0xff]  ;;  %v567_v10 = vld [vmem:[%s729_s1 + $0x10] sm:$0xff]  ;;  %s683_s14 = scalar_lea.vmem %s728_s0, %s556_s8  ;;  %s715_s24 = scalar_lea.vmem %s730_s2, %s556_s8 }
   0xe   : > { %v577_v7 = vld [vmem:[%s729_s1 + $0x60] sm:$0xff]  ;;  %v576_v9 = vld [vmem:[%s729_s1 + $0x58] sm:$0xff]  ;;  %v575_v11 = vld [vmem:[%s729_s1 + $0x50] sm:$0xff] }
   0xf   : > { %v566_v12 = vld [vmem:[%s729_s1 + $0x8] sm:$0xff]  ;;  %v565_v14 = vld [vmem:[%s729_s1] sm:$0xff]  ;;  %v468_v28 = vld [vmem:[%s683_s14 + $0x10] sm:$0xf] }
  0x10   : > { %327 = vmatpush.bf16.msra.mxu0 %v571_v2  ;;  %582 = vmatpush.bf16.msra.mxu2 %v571_v2  ;;  %v574_v13 = vld [vmem:[%s729_s1 + $0x48] sm:$0xff]  ;;  %v573_v15 = vld [vmem:[%s729_s1 + $0x40] sm:$0xff]  ;;  %v560_v29 = vld [vmem:[%s683_s14 + $0x14] sm:$0xf0] }
  0x11   : > { %356 = vmatpush.bf16.msra.mxu1 %v579_v3  ;;  %590 = vmatpush.bf16.msra.mxu3 %v579_v3  ;;  %v460_v16 = vld [vmem:[%s683_s14] sm:$0xf]  ;;  %v558_v17 = vld [vmem:[%s683_s14 + $0x4] sm:$0xf0]  ;;  %v557_v20 = vld [vmem:[%s683_s14 + $0x4] sm:$0xf]  ;;  %v469_v36 = vor.u32 %v560_v29, %v468_v28 }
  0x12   : > { %v476_v18 = vld [vmem:[%s683_s14 + $0x20] sm:$0xf]  ;;  %v562_v19 = vld [vmem:[%s683_s14 + $0x24] sm:$0xf0]  ;;  %v462_v21 = vld [vmem:[%s683_s14 + $0x8] sm:$0xf0]  ;;  %v461_v24 = vor.u32 %v558_v17, %v460_v16 }
  0x13   : > { %v561_v22 = vld [vmem:[%s683_s14 + $0x24] sm:$0xf]  ;;  %v478_v23 = vld [vmem:[%s683_s14 + $0x28] sm:$0xf0]  ;;  %v477_v25 = vor.u32 %v562_v19, %v476_v18  ;;  %v465_v26 = vor.u32 %v557_v20, %v462_v21  ;;  %v484_v30 = vld [vmem:[%s683_s14 + $0x30] sm:$0xf] }
  0x14   : > { %328 = vmatpush.bf16.msra.mxu0 %v570_v4  ;;  %583 = vmatpush.bf16.msra.mxu2 %v570_v4  ;;  %v481_v27 = vor.u32 %v561_v22, %v478_v23  ;;  %v564_v31 = vld [vmem:[%s683_s14 + $0x34] sm:$0xf0]  ;;  %v559_v32 = vld [vmem:[%s683_s14 + $0x14] sm:$0xf]  ;;  %v470_v33 = vld [vmem:[%s683_s14 + $0x18] sm:$0xf0] }
  0x15   : > { %357 = vmatpush.bf16.msra.mxu1 %v578_v5  ;;  %591 = vmatpush.bf16.msra.mxu3 %v578_v5  ;;  %v563_v34 = vld [vmem:[%s683_s14 + $0x34] sm:$0xf]  ;;  %v486_v35 = vld [vmem:[%s683_s14 + $0x38] sm:$0xf0]  ;;  %v485_v37 = vor.u32 %v564_v31, %v484_v30  ;;  %v473_v38 = vor.u32 %v559_v32, %v470_v33 }
  0x16   : > { %v489_v39 = vor.u32 %v563_v34, %v486_v35 }
  0x18   : > { %329 = vmatpush.bf16.msra.mxu0 %v569_v6  ;;  %584 = vmatpush.bf16.msra.mxu2 %v569_v6 }
  0x19   : > { %358 = vmatpush.bf16.msra.mxu1 %v577_v7  ;;  %592 = vmatpush.bf16.msra.mxu3 %v577_v7 }
  0x1c   : > { %330 = vmatpush.bf16.msra.mxu0 %v568_v8  ;;  %585 = vmatpush.bf16.msra.mxu2 %v568_v8 }
  0x1d   : > { %359 = vmatpush.bf16.msra.mxu1 %v576_v9  ;;  %593 = vmatpush.bf16.msra.mxu3 %v576_v9 }
  0x20   : > { %331 = vmatpush.bf16.msra.mxu0 %v567_v10  ;;  %586 = vmatpush.bf16.msra.mxu2 %v567_v10 }
  0x21   : > { %360 = vmatpush.bf16.msra.mxu1 %v575_v11  ;;  %594 = vmatpush.bf16.msra.mxu3 %v575_v11 }
  0x24   : > { %332 = vmatpush.bf16.msra.mxu0 %v566_v12  ;;  %587 = vmatpush.bf16.msra.mxu2 %v566_v12 }
  0x25   : > { %361 = vmatpush.bf16.msra.mxu1 %v574_v13  ;;  %595 = vmatpush.bf16.msra.mxu3 %v574_v13 }
  0x28   : > { %333 = vmatpush.bf16.msra.mxu0 %v565_v14  ;;  %588 = vmatpush.bf16.msra.mxu2 %v565_v14 }
  0x29   : > { %362 = vmatpush.bf16.msra.mxu1 %v573_v15  ;;  %596 = vmatpush.bf16.msra.mxu3 %v573_v15 }
  0x2b   : > { %334 = vmatmul.bf16.vlgmr.msra.gmra.mxu0 %v461_v24  ;;  %344 = vmatmul.bf16.vlgmr.msra.gmra.mxu2 %v477_v25 }
  0x2c   : > { %363 = vmatmul.bf16.vlgmr.msra.gmra.mxu1 %v465_v26  ;;  %373 = vmatmul.bf16.vlgmr.msra.gmra.mxu3 %v481_v27 }
  0x3b   : > { %339 = vmatmul.bf16.gmra.mxu0 %v469_v36  ;;  %349 = vmatmul.bf16.gmra.mxu2 %v485_v37 }
  0x3c   : > { %368 = vmatmul.bf16.gmra.mxu1 %v473_v38  ;;  %378 = vmatmul.bf16.gmra.mxu3 %v489_v39 }
  0xa8   : > { %v335_v40 = vpop.f32.mrf.mxu0 }
  0xa9   : > { %v364_v41 = vpop.f32.mrf.mxu1 }
  0xaa   : > { %v365_v42 = vadd.f32 %v364_v41, %v335_v40 }
  0xac   : > { %384 = vst [vmem:[%s715_s24] sm:$0xff] %v365_v42 }
  0xae   : > { %v345_v43 = vpop.f32.mrf.mxu2 }
  0xaf   : > { %v374_v44 = vpop.f32.mrf.mxu3 }
  0xb0   : > { %v375_v45 = vadd.f32 %v374_v44, %v345_v43  ;;  %v337_v46 = vpop.f32.mrf.mxu0 }
  0xb1   : > { %v366_v47 = vpop.f32.mrf.mxu1 }
  0xb2   : > { %388 = vst [vmem:[%s715_s24 + $0x20] sm:$0xff] %v375_v45  ;;  %v367_v48 = vadd.f32 %v366_v47, %v337_v46 }
  0xb4   : > { %385 = vst [vmem:[%s715_s24 + $0x8] sm:$0xff] %v367_v48 }
  0xb6   : > { %v347_v49 = vpop.f32.mrf.mxu2 }
  0xb7   : > { %v376_v50 = vpop.f32.mrf.mxu3 }
  0xb8   : > { %v377_v51 = vadd.f32 %v376_v50, %v347_v49  ;;  %v340_v52 = vpop.f32.mrf.mxu0 }
  0xb9   : > { %v369_v53 = vpop.f32.mrf.mxu1 }
  0xba   : > { %389 = vst [vmem:[%s715_s24 + $0x28] sm:$0xff] %v377_v51  ;;  %v370_v54 = vadd.f32 %v369_v53, %v340_v52 }
  0xbc   : > { %386 = vst [vmem:[%s715_s24 + $0x10] sm:$0xff] %v370_v54 }
  0xbe   : > { %v350_v55 = vpop.f32.mrf.mxu2 }
  0xbf   : > { %v379_v56 = vpop.f32.mrf.mxu3 }
  0xc0   : > { %v380_v57 = vadd.f32 %v379_v56, %v350_v55  ;;  %v342_v58 = vpop.f32.mrf.mxu0 }
  0xc1   : > { %v371_v59 = vpop.f32.mrf.mxu1 }
  0xc2   : > { %390 = vst [vmem:[%s715_s24 + $0x30] sm:$0xff] %v380_v57  ;;  %v372_v60 = vadd.f32 %v371_v59, %v342_v58 }
  0xc4   : > { %387 = vst [vmem:[%s715_s24 + $0x18] sm:$0xff] %v372_v60 }
  0xc6   : > { %v352_v61 = vpop.f32.mrf.mxu2 }
  0xc7   : > { %v381_v62 = vpop.f32.mrf.mxu3 }
  0xc8   : > { %v382_v63 = vadd.f32 %v381_v62, %v352_v61 }
  0xca   : > { %391 = vst [vmem:[%s715_s24 + $0x38] sm:$0xff] %v382_v63 }
  0xcb PF: > { %s12_s9 = sadd.s32 1, %s611_s9  }
  0xcc   : > { %p9_p4 = scmp.ge.s32.totalorder %s12_s9, 4  }
  0xce   :  { %11 = sbr.rel (!%p9_p4) target bundleno = 1 (0x1), region = 58 }

// kernel: qwen3_moe_forward.3
= control target key start
LH: loop header
LB: loop body
LE: loop exit
PB: predicated region body
PF: predicated region fallthrough
CT: control target
= control target key end

     0   :  { %s2483_s29 = smov [#allocation5]   ;;  %s3196_s0 = inlined_call_operand.<no memory space> [shape: s32[1], index: 0, kind: input, shape index: {}]   ;;  %s3197_s1 = inlined_call_operand.vmem [shape: s32[8], index: 1, kind: input, shape index: {}]   ;;  %s3198_s2 = inlined_call_operand.vmem [shape: bf16[128,256], index: 2, kind: input, shape index: {}]   ;;  %s3199_s3 = inlined_call_operand.vmem [shape: f32[8,128,1], index: 3, kind: input, shape index: {}]   ;;  %s3200_s4 = inlined_call_operand.vmem [shape: bf16[8,256,256], index: 4, kind: input, shape index: {}]   ;;  %s3201_s5 = inlined_call_operand.vmem [shape: bf16[8,256,256], index: 5, kind: input, shape index: {}]   ;;  %s3202_s6 = inlined_call_operand.vmem [shape: bf16[8,256,256], index: 6, kind: input, shape index: {}]   ;;  %s3203_s7 = inlined_call_operand.hbm [shape: bf16[128,256], index: 7, kind: output, shape index: {}]  }
   0x1   :  { %3217 = sst [smem:[#allocation26_spill]] %s3198_s2  ;;  %s14_s28 = sshll.u32 %s3197_s1, 4  ;;  %s15_s28 = int_to_ptr.vmem [resolvable:$true] %s14_s28 }
   0x2   :  { %3218 = sst [smem:[#allocation27_spill]] %s3199_s3 }
   0x3   :  { %3219 = sst [smem:[#allocation28_spill]] %s3200_s4 }
   0x4   :  { %3220 = sst [smem:[#allocation29_spill]] %s3201_s5 }
   0x5   :  { %3221 = sst [smem:[#allocation30_spill]] %s3202_s6 }
   0x6   :  { %3222 = sst [smem:[#allocation31_spill]] %s3203_s7 }
   0x7   :  { %12 = sst [smem:[#allocation4]] %s3196_s0 }
   0x8   :  { %17 = dma.vmem_to_smem %s15_s28, 16, %s2483_s29, [#allocation3] }
   0x9   :  { %2421 = dma.done.wait [#allocation3], 16 }
   0xa   :  { %2422 = vsyncadd [#allocation3], 4294967280 }
   0xb   :  { %20 = sfence }
   0xc   :  { %21 = vsyncpa [#allocation9], 0 }
   0xd   :  { %23 = vsyncpa [#allocation9 + $0x1], 0  ;;  %s2534_s30 = smov 0   ;;  %s2536_s8 = smov 0  }
   0xe   :  { %s2538_s9 = smov 0   ;;  %s2540_s10 = smov 0  }
   0xf   :  { %s2542_s0 = smov 0   ;;  %s2544_s11 = smov 0  }
  0x10   :  { %s2546_s1 = smov 0   ;;  %s2548_s12 = smov 0  }
  0x11   :  { %s2550_s13 = smov 0   ;;  %s2552_s14 = smov 0  }
  0x12   :  { %s2554_s15 = smov 0   ;;  %s2556_s16 = smov 0  }
  0x13   :  { %s2558_s17 = smov 0   ;;  %s2560_s18 = smov 0  }
  0x14 LB: > { %3223 = sst [smem:[#allocation12_spill]] %s2437_s9  ;;  %s41_s21 = sadd.s32 1, %s2469_s15  ;;  %s2481_s18 = sphi %s2560_s18, %s29_s18   ;;  %s2477_s17 = sphi %s2558_s17, %s3273_s17   ;;  %s2473_s16 = sphi %s2556_s16, %s3272_s16   ;;  %s2469_s15 = sphi %s2554_s15, %s3271_s15   ;;  %s2465_s14 = sphi %s2552_s14, %s3270_s14   ;;  %s2461_s13 = sphi %s2550_s13, %s3269_s13   ;;  %s2457_s12 = sphi %s2548_s12, %s3268_s12   ;;  %s2453_s1 = sphi %s2546_s1, %s3267_s1   ;;  %s2449_s11 = sphi %s2544_s11, %s3277_s11   ;;  %s2445_s0 = sphi %s2542_s0, %s3265_s0   ;;  %s2441_s10 = sphi %s2540_s10, %s3264_s10   ;;  %s2437_s9 = sphi %s2538_s9, %s3263_s9   ;;  %s2433_s8 = sphi %s2536_s8, %s3276_s8   ;;  %s2429_s30 = sphi %s2534_s30, %s3275_s30  }
  0x15   : > { %3224 = sst [smem:[#allocation13_spill]] %s2445_s0  ;;  %s44_s22 = sadd.s32 1, %s2473_s16 }
  0x16   : > { %3225 = sst [smem:[#allocation14_spill]] %s2453_s1  ;;  %p42_p0 = scmp.ge.s32.totalorder %s41_s21, 8 }
  0x17   : > { %3226 = sst [smem:[#allocation15_spill]] %s2461_s13  ;;  %s48_s23 = sadd.s32 1, %s2477_s17 }
  0x18   : > { %3227 = sst [smem:[#allocation16_spill]] %s2469_s15  ;;  %s115_s25 = sadd.s32 1, %s2453_s1 }
  0x19   : > { %3228 = sst [smem:[#allocation17_spill]] %s2473_s16  ;;  %s3279_s21 = smov (%p42_p0, %s41_s21), 0 }
  0x1a   : > { %3229 = sst [smem:[#allocation18_spill]] %s2477_s17  ;;  %s3281_s22 = smov (!%p42_p0, %s44_s22), %s2473_s16 }
  0x1b   : > { %s108_s24 = sld [smem:[#allocation5 + %s2469_s15]]  ;;  %p122_p1 = scmp.ne.s32.totalorder %s2453_s1, %s2449_s11 }
  0x1c   : > { %3230 = sst [smem:[#allocation19_spill]] %s3279_s21  ;;  %p46_p2 = scmp.ge.s32.totalorder %s3281_s22, 2 }
  0x1d   : > { %s109_s26 = sld [smem:[#allocation5 + %s3279_s21]]  ;;  %p123_p3 = scmp.eq.s32.totalorder %s2481_s18, 0 }
  0x1e   : > { %s138_s27 = sld [smem:[#allocation5 + %s2469_s15]]  ;;  %s145_s28 = sadd.s32 1, %s2445_s0 }
  0x1f   : > { %s3283_s22 = smov (%p46_p2, %s3281_s22), 0  ;;  %s3285_s23 = smov (!%p46_p2, %s48_s23), %s2477_s17 }
  0x20   : > { %3231 = sst [smem:[#allocation20_spill]] %s3283_s22  ;;  %s111_s29 = ssub.s32 %s2473_s16, %s3283_s22 }
  0x21   : > { %p2627_p4 = por %p123_p3, %p122_p1  ;;  %p50_p5 = scmp.ge.s32.totalorder %s3285_s23, 2 }
  0x22   : > { %s139_s6 = sld [smem:[#allocation5 + %s3279_s21]]  ;;  %p152_p7 = scmp.ne.s32.totalorder %s2445_s0, %s2441_s10 }
  0x23   : > { %s110_s19 = ssub.s32 %s108_s24, %s109_s26  ;;  %s3287_s23 = smov (%p50_p5, %s3285_s23), 0 }
  0x24   : > { %s112_s7 = sor.u32 %s111_s29, %s110_s19  ;;  %3233 = sst [smem:[#allocation21_spill]] %s3287_s23 }
  0x25   : > { %p113_p6 = scmp.eq.s32.totalorder %s112_s7, 0  ;;  %s198_s22 = ssub.s32 %s2477_s17, %s3287_s23 }
  0x26   : > { %s201_s3 = sadd.s32 1, %s2437_s9  ;;  %p2644_p8 = por %p152_p7, %p123_p3 }
  0x27   : > { %s2640_s2 = scalar_select %p113_p6, %s2453_s1, %s115_s25  }
  0x28   : > { %p199_p9 = scmp.eq.s32.totalorder %s198_s22, 0  ;;  %s140_s19 = ssub.s32 %s138_s27, %s139_s6 }
  0x29   : > { %3234 = sst [smem:[#allocation22_spill]] %s2640_s2  ;;  %p211_p10 = scmp.ne.s32.totalorder %s2437_s9, %s2433_s8 }
  0x2a   : > { %s142_s24 = sor.u32 %s140_s19, %s111_s29  ;;  %s3236_s26 = sadd.s32 4294967295, %s2481_s18  }
  0x2b   : > { %p212_p11 = scmp.eq.s32.totalorder %s3236_s26, 31  ;;  %p143_p12 = scmp.eq.s32.totalorder %s142_s24, 0 }
  0x2c   : > { %p217_p13 = scmp.ne.s32.totalorder %s2433_s8, %s2429_s30  ;;  %s3240_s23 = sadd.s32 4294967294, %s2481_s18  }
  0x2d   : > { %s2655_s7 = scalar_select %p199_p9, %s2437_s9, %s201_s3  }
  0x2e   : > { %s2658_s21 = scalar_select %p143_p12, %s2445_s0, %s145_s28  }
  0x2f   : > { %3237 = sst [smem:[#allocation23_spill]] %s2655_s7  ;;  %p2660_p0 = por %p212_p11, %p211_p10 }
  0x30   : > { %3238 = sst [smem:[#allocation24_spill]] %s2658_s21  ;;  %p218_p1 = scmp.eq.s32.totalorder %s3240_s23, 31 }
  0x31   : > { %p1831_p3 = scmp.ge.s32.totalorder %s2481_s18, 32 }
  0x32   : > { %p2666_p2 = por %p218_p1, %p217_p13 }
  0x33   : > { %234 = sbr.rel (%p1831_p3) target bundleno = 142 (0x8e), region = 16 }
  0x34   : > { %s3241_s17 = scalar_select %p2666_p2, 1, 0 }
  0x36   : > { %3242 = sst [smem:[#allocation25_spill]] %s3241_s17 }
  0x38   : > { %262 = sbr.rel (!%p2627_p4) target bundleno = 99 (0x63), region = 28  ;;  %s267_s3 = sld [smem:[#allocation5 + %s2469_s15]] (%p2627_p4) }
  0x39   : > { %s264_s6 = sand.u32 (%p2627_p4), 1, %s2453_s1   ;;  %s3243_s4 = sld [smem:[#allocation28_spill]] (%p2627_p4) }
  0x3a   : > { %s1832_s22 = sshll.u32 (%p2627_p4), %s264_s6, 7 }
  0x3b   : > { %s2684_s20 = scalar_lea.vmem (%p2627_p4), [#allocation6], %s1832_s22 }
  0x3e   : > { %s1833_s27 = sshll.u32 %s267_s3, 6 }
  0x3f   : > { %s269_s28 = sadd.s32 %s2473_s16, %s1833_s27 }
  0x40   : > { %s1834_s29 = sshll.u32 %s269_s28, 2 }
  0x41   : > { %s2679_s24 = scalar_lea.vmem %s3243_s4, %s1834_s29 }
  0x42   : > { %v288_v0 = vld [vmem:[%s2679_s24] sm:$0xf]  ;;  %v290_v1 = vld [vmem:[%s2679_s24 + $0x8] sm:$0xf]  ;;  %v292_v2 = vld [vmem:[%s2679_s24 + $0x10] sm:$0xf] }
  0x43   : > { %289 = vst [vmem:[%s2684_s20] sm:$0xf] %v288_v0  ;;  %v294_v3 = vld [vmem:[%s2679_s24 + $0x18] sm:$0xf]  ;;  %v296_v4 = vld [vmem:[%s2679_s24 + $0x20] sm:$0xf] }
  0x44   : > { %291 = vst [vmem:[%s2684_s20 + $0x4] sm:$0xf] %v290_v1  ;;  %v298_v5 = vld [vmem:[%s2679_s24 + $0x28] sm:$0xf]  ;;  %v300_v6 = vld [vmem:[%s2679_s24 + $0x30] sm:$0xf] }
  0x45   : > { %293 = vst [vmem:[%s2684_s20 + $0x8] sm:$0xf] %v292_v2  ;;  %v302_v7 = vld [vmem:[%s2679_s24 + $0x38] sm:$0xf]  ;;  %v304_v8 = vld [vmem:[%s2679_s24 + $0x40] sm:$0xf] }
  0x46   : > { %295 = vst [vmem:[%s2684_s20 + $0xc] sm:$0xf] %v294_v3  ;;  %v306_v9 = vld [vmem:[%s2679_s24 + $0x48] sm:$0xf]  ;;  %v308_v10 = vld [vmem:[%s2679_s24 + $0x50] sm:$0xf] }
  0x47   : > { %297 = vst [vmem:[%s2684_s20 + $0x10] sm:$0xf] %v296_v4  ;;  %v310_v11 = vld [vmem:[%s2679_s24 + $0x58] sm:$0xf]  ;;  %v312_v12 = vld [vmem:[%s2679_s24 + $0x60] sm:$0xf] }
  0x48   : > { %299 = vst [vmem:[%s2684_s20 + $0x14] sm:$0xf] %v298_v5  ;;  %v314_v13 = vld [vmem:[%s2679_s24 + $0x68] sm:$0xf]  ;;  %v316_v14 = vld [vmem:[%s2679_s24 + $0x70] sm:$0xf] }
  0x49   : > { %301 = vst [vmem:[%s2684_s20 + $0x18] sm:$0xf] %v300_v6  ;;  %v318_v15 = vld [vmem:[%s2679_s24 + $0x78] sm:$0xf]  ;;  %v320_v16 = vld [vmem:[%s2679_s24 + $0x80] sm:$0xf] }
  0x4a   : > { %303 = vst [vmem:[%s2684_s20 + $0x1c] sm:$0xf] %v302_v7  ;;  %v322_v17 = vld [vmem:[%s2679_s24 + $0x88] sm:$0xf]  ;;  %v324_v18 = vld [vmem:[%s2679_s24 + $0x90] sm:$0xf] }
  0x4b   : > { %305 = vst [vmem:[%s2684_s20 + $0x20] sm:$0xf] %v304_v8  ;;  %v326_v19 = vld [vmem:[%s2679_s24 + $0x98] sm:$0xf]  ;;  %v328_v20 = vld [vmem:[%s2679_s24 + $0xa0] sm:$0xf] }
  0x4c   : > { %307 = vst [vmem:[%s2684_s20 + $0x24] sm:$0xf] %v306_v9  ;;  %v330_v21 = vld [vmem:[%s2679_s24 + $0xa8] sm:$0xf]  ;;  %v332_v22 = vld [vmem:[%s2679_s24 + $0xb0] sm:$0xf] }
  0x4d   : > { %309 = vst [vmem:[%s2684_s20 + $0x28] sm:$0xf] %v308_v10  ;;  %v334_v23 = vld [vmem:[%s2679_s24 + $0xb8] sm:$0xf]  ;;  %v336_v24 = vld [vmem:[%s2679_s24 + $0xc0] sm:$0xf] }
  0x4e   : > { %311 = vst [vmem:[%s2684_s20 + $0x2c] sm:$0xf] %v310_v11  ;;  %v338_v25 = vld [vmem:[%s2679_s24 + $0xc8] sm:$0xf]  ;;  %v340_v26 = vld [vmem:[%s2679_s24 + $0xd0] sm:$0xf] }
  0x4f   : > { %313 = vst [vmem:[%s2684_s20 + $0x30] sm:$0xf] %v312_v12  ;;  %v342_v27 = vld [vmem:[%s2679_s24 + $0xd8] sm:$0xf]  ;;  %v344_v28 = vld [vmem:[%s2679_s24 + $0xe0] sm:$0xf] }
  0x50   : > { %315 = vst [vmem:[%s2684_s20 + $0x34] sm:$0xf] %v314_v13  ;;  %v346_v29 = vld [vmem:[%s2679_s24 + $0xe8] sm:$0xf]  ;;  %v348_v30 = vld [vmem:[%s2679_s24 + $0xf0] sm:$0xf] }
  0x51   : > { %317 = vst [vmem:[%s2684_s20 + $0x38] sm:$0xf] %v316_v14  ;;  %v350_v31 = vld [vmem:[%s2679_s24 + $0xf8] sm:$0xf] }
  0x52   : > { %319 = vst [vmem:[%s2684_s20 + $0x3c] sm:$0xf] %v318_v15 }
  0x53   : > { %321 = vst [vmem:[%s2684_s20 + $0x40] sm:$0xf] %v320_v16 }
  0x54   : > { %323 = vst [vmem:[%s2684_s20 + $0x44] sm:$0xf] %v322_v17 }
  0x55   : > { %325 = vst [vmem:[%s2684_s20 + $0x48] sm:$0xf] %v324_v18 }
  0x56   : > { %327 = vst [vmem:[%s2684_s20 + $0x4c] sm:$0xf] %v326_v19 }
  0x57   : > { %329 = vst [vmem:[%s2684_s20 + $0x50] sm:$0xf] %v328_v20 }
  0x58   : > { %331 = vst [vmem:[%s2684_s20 + $0x54] sm:$0xf] %v330_v21 }
  0x59   : > { %333 = vst [vmem:[%s2684_s20 + $0x58] sm:$0xf] %v332_v22 }
  0x5a   : > { %335 = vst [vmem:[%s2684_s20 + $0x5c] sm:$0xf] %v334_v23 }
  0x5b   : > { %337 = vst [vmem:[%s2684_s20 + $0x60] sm:$0xf] %v336_v24 }
  0x5c   : > { %339 = vst [vmem:[%s2684_s20 + $0x64] sm:$0xf] %v338_v25 }
  0x5d   : > { %341 = vst [vmem:[%s2684_s20 + $0x68] sm:$0xf] %v340_v26 }
  0x5e   : > { %343 = vst [vmem:[%s2684_s20 + $0x6c] sm:$0xf] %v342_v27 }
  0x5f   : > { %345 = vst [vmem:[%s2684_s20 + $0x70] sm:$0xf] %v344_v28 }
  0x60   : > { %347 = vst [vmem:[%s2684_s20 + $0x74] sm:$0xf] %v346_v29 }
  0x61   : > { %349 = vst [vmem:[%s2684_s20 + $0x78] sm:$0xf] %v348_v30 }
  0x62   : > { %351 = vst [vmem:[%s2684_s20 + $0x7c] sm:$0xf] %v350_v31 }
  0x63 PF: > { %439 = sbr.rel (!%p2644_p8) target bundleno = 142 (0x8e), region = 69  ;;  %s444_s26 = sld [smem:[#allocation5 + %s2469_s15]] (%p2644_p8) }
  0x64   : > { %s441_s3 = sand.u32 (%p2644_p8), 1, %s2445_s0   ;;  %s3244_s5 = sld [smem:[#allocation29_spill]] (%p2644_p8) }
  0x65   : > { %s1835_s6 = sshll.u32 (%p2644_p8), %s441_s3, 7 }
  0x66   : > { %s2760_s13 = scalar_lea.vmem (%p2644_p8), [#allocation7], %s1835_s6 }
  0x69   : > { %s1836_s22 = sshll.u32 %s444_s26, 6 }
  0x6a   : > { %s446_s27 = sadd.s32 %s2473_s16, %s1836_s22 }
  0x6b   : > { %s1837_s28 = sshll.u32 %s446_s27, 2 }
  0x6c   : > { %s2755_s19 = scalar_lea.vmem %s3244_s5, %s1837_s28 }
  0x6d   : > { %v465_v32 = vld [vmem:[%s2755_s19] sm:$0xf]  ;;  %v467_v33 = vld [vmem:[%s2755_s19 + $0x8] sm:$0xf]  ;;  %v469_v34 = vld [vmem:[%s2755_s19 + $0x10] sm:$0xf] }
  0x6e   : > { %466 = vst [vmem:[%s2760_s13] sm:$0xf] %v465_v32  ;;  %v471_v35 = vld [vmem:[%s2755_s19 + $0x18] sm:$0xf]  ;;  %v473_v36 = vld [vmem:[%s2755_s19 + $0x20] sm:$0xf] }
  0x6f   : > { %468 = vst [vmem:[%s2760_s13 + $0x4] sm:$0xf] %v467_v33  ;;  %v475_v37 = vld [vmem:[%s2755_s19 + $0x28] sm:$0xf]  ;;  %v477_v38 = vld [vmem:[%s2755_s19 + $0x30] sm:$0xf] }
  0x70   : > { %470 = vst [vmem:[%s2760_s13 + $0x8] sm:$0xf] %v469_v34  ;;  %v479_v39 = vld [vmem:[%s2755_s19 + $0x38] sm:$0xf]  ;;  %v481_v40 = vld [vmem:[%s2755_s19 + $0x40] sm:$0xf] }
  0x71   : > { %472 = vst [vmem:[%s2760_s13 + $0xc] sm:$0xf] %v471_v35  ;;  %v483_v41 = vld [vmem:[%s2755_s19 + $0x48] sm:$0xf]  ;;  %v485_v42 = vld [vmem:[%s2755_s19 + $0x50] sm:$0xf] }
  0x72   : > { %474 = vst [vmem:[%s2760_s13 + $0x10] sm:$0xf] %v473_v36  ;;  %v487_v43 = vld [vmem:[%s2755_s19 + $0x58] sm:$0xf]  ;;  %v489_v44 = vld [vmem:[%s2755_s19 + $0x60] sm:$0xf] }
  0x73   : > { %476 = vst [vmem:[%s2760_s13 + $0x14] sm:$0xf] %v475_v37  ;;  %v491_v45 = vld [vmem:[%s2755_s19 + $0x68] sm:$0xf]  ;;  %v493_v46 = vld [vmem:[%s2755_s19 + $0x70] sm:$0xf] }
  0x74   : > { %478 = vst [vmem:[%s2760_s13 + $0x18] sm:$0xf] %v477_v38  ;;  %v495_v47 = vld [vmem:[%s2755_s19 + $0x78] sm:$0xf]  ;;  %v497_v48 = vld [vmem:[%s2755_s19 + $0x80] sm:$0xf] }
  0x75   : > { %480 = vst [vmem:[%s2760_s13 + $0x1c] sm:$0xf] %v479_v39  ;;  %v499_v49 = vld [vmem:[%s2755_s19 + $0x88] sm:$0xf]  ;;  %v501_v50 = vld [vmem:[%s2755_s19 + $0x90] sm:$0xf] }
  0x76   : > { %482 = vst [vmem:[%s2760_s13 + $0x20] sm:$0xf] %v481_v40  ;;  %v503_v51 = vld [vmem:[%s2755_s19 + $0x98] sm:$0xf]  ;;  %v505_v52 = vld [vmem:[%s2755_s19 + $0xa0] sm:$0xf] }
  0x77   : > { %484 = vst [vmem:[%s2760_s13 + $0x24] sm:$0xf] %v483_v41  ;;  %v507_v53 = vld [vmem:[%s2755_s19 + $0xa8] sm:$0xf]  ;;  %v509_v54 = vld [vmem:[%s2755_s19 + $0xb0] sm:$0xf] }
  0x78   : > { %486 = vst [vmem:[%s2760_s13 + $0x28] sm:$0xf] %v485_v42  ;;  %v511_v55 = vld [vmem:[%s2755_s19 + $0xb8] sm:$0xf]  ;;  %v513_v56 = vld [vmem:[%s2755_s19 + $0xc0] sm:$0xf] }
  0x79   : > { %488 = vst [vmem:[%s2760_s13 + $0x2c] sm:$0xf] %v487_v43  ;;  %v515_v57 = vld [vmem:[%s2755_s19 + $0xc8] sm:$0xf]  ;;  %v517_v58 = vld [vmem:[%s2755_s19 + $0xd0] sm:$0xf] }
  0x7a   : > { %490 = vst [vmem:[%s2760_s13 + $0x30] sm:$0xf] %v489_v44  ;;  %v519_v59 = vld [vmem:[%s2755_s19 + $0xd8] sm:$0xf]  ;;  %v521_v60 = vld [vmem:[%s2755_s19 + $0xe0] sm:$0xf] }
  0x7b   : > { %492 = vst [vmem:[%s2760_s13 + $0x34] sm:$0xf] %v491_v45  ;;  %v523_v61 = vld [vmem:[%s2755_s19 + $0xe8] sm:$0xf]  ;;  %v525_v62 = vld [vmem:[%s2755_s19 + $0xf0] sm:$0xf] }
  0x7c   : > { %494 = vst [vmem:[%s2760_s13 + $0x38] sm:$0xf] %v493_v46  ;;  %v527_v63 = vld [vmem:[%s2755_s19 + $0xf8] sm:$0xf] }
  0x7d   : > { %496 = vst [vmem:[%s2760_s13 + $0x3c] sm:$0xf] %v495_v47 }
  0x7e   : > { %498 = vst [vmem:[%s2760_s13 + $0x40] sm:$0xf] %v497_v48 }
  0x7f   : > { %500 = vst [vmem:[%s2760_s13 + $0x44] sm:$0xf] %v499_v49 }
  0x80   : > { %502 = vst [vmem:[%s2760_s13 + $0x48] sm:$0xf] %v501_v50 }
  0x81   : > { %504 = vst [vmem:[%s2760_s13 + $0x4c] sm:$0xf] %v503_v51 }
  0x82   : > { %506 = vst [vmem:[%s2760_s13 + $0x50] sm:$0xf] %v505_v52 }
  0x83   : > { %508 = vst [vmem:[%s2760_s13 + $0x54] sm:$0xf] %v507_v53 }
  0x84   : > { %510 = vst [vmem:[%s2760_s13 + $0x58] sm:$0xf] %v509_v54 }
  0x85   : > { %512 = vst [vmem:[%s2760_s13 + $0x5c] sm:$0xf] %v511_v55 }
  0x86   : > { %514 = vst [vmem:[%s2760_s13 + $0x60] sm:$0xf] %v513_v56 }
  0x87   : > { %516 = vst [vmem:[%s2760_s13 + $0x64] sm:$0xf] %v515_v57 }
  0x88   : > { %518 = vst [vmem:[%s2760_s13 + $0x68] sm:$0xf] %v517_v58 }
  0x89   : > { %520 = vst [vmem:[%s2760_s13 + $0x6c] sm:$0xf] %v519_v59 }
  0x8a   : > { %522 = vst [vmem:[%s2760_s13 + $0x70] sm:$0xf] %v521_v60 }
  0x8b   : > { %524 = vst [vmem:[%s2760_s13 + $0x74] sm:$0xf] %v523_v61 }
  0x8c   : > { %526 = vst [vmem:[%s2760_s13 + $0x78] sm:$0xf] %v525_v62 }
  0x8d   : > { %528 = vst [vmem:[%s2760_s13 + $0x7c] sm:$0xf] %v527_v63 }
  0x8e PF: > { %p1838_p4 = scmp.ge.s32.totalorder %s2481_s18, 1  ;;  %p631_p5 = scmp.lt.s32.totalorder %s2481_s18, 33 }
  0x90   : > { %p632_p6 = pnand %p1838_p4, %p631_p5 }
  0x91   : > { %s3245_s24 = sld [smem:[#allocation15_spill]] (!%p632_p6)  ;;  %s638_s20 = sand.u32 (!%p632_p6), 1, %s2449_s11  }
  0x92   : > { %635 = sbr.rel (%p632_p6) target bundleno = 648 (0x288), region = 114  ;;  %s645_s26 = sand.u32 (!%p632_p6), 1, %s2441_s10  }
  0x93   : > { %s2827_s3 = sshll.u32 (!%p632_p6), %s638_s20, 7  ;;  %s2829_s6 = sshll.u32 (!%p632_p6), %s645_s26, 7 }
  0x94   : > { %s3210_s22 = sand.u32 (!%p632_p6), 1, %s2433_s8   ;;  %s1842_s27 = sshll.u32 (!%p632_p6), %s2465_s14, 3 }
  0x95   : > { %s1841_s28 = sshll.u32 (!%p632_p6), %s3210_s22, 6  ;;  %p704_p7 = scmp.lt.s32.totalorder (!%p632_p6), %s1842_s27, 15 }
  0x96   : > { %s710_s29 = sld [smem:[#allocation5 + %s2457_s12]] (!%p632_p6)  ;;  %p739_p11 = scmp.eq.s32.totalorder (!%p632_p6), %s2457_s12, 0 }
  0x97   : > { %s3289_s27 = smov (!%p704_p7, %s1842_s27), 15  ;;  %s724_s23 = sld [smem:[#allocation5 + %s2457_s12]] }
  0x98   : > { %s1848_s19 = sshll.u32 %s3245_s24, 4  ;;  %s2091_s13 = sshll.u32 %s3289_s27, 3 }
  0x99   : > { %p728_p8 = scmp.lt.s32.totalorder %s1848_s19, 31  ;;  %s3246_s11 = sld [smem:[#allocation26_spill]] }
  0x9a   : > { %p738_p9 = scmp.eq.s32.totalorder %s3245_s24, 0  ;;  %s3248_s4 = sld [smem:[#allocation27_spill]] }
  0x9b   : > { %s3291_s19 = smov (!%p728_p8, %s1848_s19), 31  ;;  %s3249_s7 = sld [smem:[#allocation30_spill]] }
  0x9c   : > { %p712_p10 = scmp.lt.s32.totalorder %s710_s29, 7  ;;  %p2845_p12 = pnand %p739_p11, %p738_p9 }
  0x9d   : > { %p726_p13 = scmp.lt.s32.totalorder %s724_s23, 7  ;;  %s1849_s24 = sshll.u32 %s3291_s19, 1 }
  0x9e   : > { %s3293_s29 = smov (!%p712_p10, %s710_s29), 7  ;;  %s2860_s17 = scalar_lea.vmem [#allocation6], %s2827_s3 }
  0x9f   : > { %s2841_s10 = scalar_lea.vmem %s3246_s11, %s2091_s13  ;;  %s1846_s26 = sshll.u32 %s3293_s29, 4 }
  0xa0   : > { %s717_s22 = sadd.s32 %s1846_s26, %s3289_s27  ;;  %s3295_s23 = smov (!%p726_p13, %s724_s23), 7 }
  0xa1   : > { %s1847_s16 = sshll.u32 %s717_s22, 3  ;;  %s1850_s13 = sshll.u32 %s3295_s23, 6 }
  0xa2   : > { %s2852_s5 = scalar_lea.vmem %s3248_s4, %s1847_s16  ;;  %s732_s11 = sadd.s32 %s1850_s13, %s1849_s24 }
  0xa3   : > { %s1851_s1 = sshll.u32 %s732_s11, 2  ;;  %s2863_s29 = scalar_lea.vmem [#allocation7], %s2829_s6 }
  0xa4   : > { %s2857_s9 = scalar_lea.vmem %s3249_s7, %s1851_s1  ;;  %s2865_s22 = scalar_lea.vmem [#allocation8], %s1841_s28 }
  0xa5   : > { %743 = sbr.rel (%p2845_p12) target bundleno = 187 (0xbb), region = 126 }
  0xaa   : > { %v2484_v0 = vmov 0.0  }
  0xab   : > { %744 = vst [vmem:[#allocation2 + $0x30] sm:$0xff] %v2484_v0 }
  0xac   : > { %745 = vst [vmem:[#allocation2] sm:$0xff] %v2484_v0 }
  0xad   : > { %746 = vst [vmem:[#allocation2 + $0x58] sm:$0xff] %v2484_v0 }
  0xae   : > { %747 = vst [vmem:[#allocation2 + $0x18] sm:$0xff] %v2484_v0 }
  0xaf   : > { %748 = vst [vmem:[#allocation2 + $0x50] sm:$0xff] %v2484_v0 }
  0xb0   : > { %749 = vst [vmem:[#allocation2 + $0x68] sm:$0xff] %v2484_v0 }
  0xb1   : > { %750 = vst [vmem:[#allocation2 + $0x8] sm:$0xff] %v2484_v0 }
  0xb2   : > { %751 = vst [vmem:[#allocation2 + $0x48] sm:$0xff] %v2484_v0 }
  0xb3   : > { %752 = vst [vmem:[#allocation2 + $0x40] sm:$0xff] %v2484_v0 }
  0xb4   : > { %753 = vst [vmem:[#allocation2 + $0x20] sm:$0xff] %v2484_v0 }
  0xb5   : > { %754 = vst [vmem:[#allocation2 + $0x10] sm:$0xff] %v2484_v0 }
  0xb6   : > { %755 = vst [vmem:[#allocation2 + $0x38] sm:$0xff] %v2484_v0 }
  0xb7   : > { %756 = vst [vmem:[#allocation2 + $0x60] sm:$0xff] %v2484_v0 }
  0xb8   : > { %757 = vst [vmem:[#allocation2 + $0x70] sm:$0xff] %v2484_v0 }
  0xb9   : > { %758 = vst [vmem:[#allocation2 + $0x78] sm:$0xff] %v2484_v0 }
  0xba   : > { %759 = vst [vmem:[#allocation2 + $0x28] sm:$0xff] %v2484_v0 }
  0xbb PF: > { %s760_s2 = sld [smem:[#allocation4]] }
  0xc1   : > { %p1852_p1 = scmp.ge.s32.totalorder %s2457_s12, %s760_s2 }
  0xc3   : > { %764 = sbr.rel (%p1852_p1) target bundleno = 601 (0x259), region = 130 }
  0xc8   : > { %v2107_v1 = vld [vmem:[%s2860_s17 + $0x38] sm:$0xff]  ;;  %v2106_v3 = vld [vmem:[%s2860_s17 + $0x30] sm:$0xff]  ;;  %v2105_v5 = vld [vmem:[%s2860_s17 + $0x28] sm:$0xff]  ;;  %v2485_v34 = vmov 0  }
  0xc9   : > { %v2115_v2 = vld [vmem:[%s2860_s17 + $0x78] sm:$0xff]  ;;  %941 = vmatpush.bf16.msra.mxu0 %v2107_v1  ;;  %2150 = vmatpush.bf16.msra.mxu2 %v2107_v1  ;;  %v2114_v4 = vld [vmem:[%s2860_s17 + $0x70] sm:$0xff]  ;;  %v2113_v6 = vld [vmem:[%s2860_s17 + $0x68] sm:$0xff] }
  0xca   : > { %970 = vmatpush.bf16.msra.mxu1 %v2115_v2  ;;  %2158 = vmatpush.bf16.msra.mxu3 %v2115_v2  ;;  %v2104_v7 = vld [vmem:[%s2860_s17 + $0x20] sm:$0xff]  ;;  %v2103_v9 = vld [vmem:[%s2860_s17 + $0x18] sm:$0xff]  ;;  %v2102_v11 = vld [vmem:[%s2860_s17 + $0x10] sm:$0xff] }
  0xcb   : > { %v2112_v8 = vld [vmem:[%s2860_s17 + $0x60] sm:$0xff]  ;;  %v2111_v10 = vld [vmem:[%s2860_s17 + $0x58] sm:$0xff]  ;;  %v2110_v12 = vld [vmem:[%s2860_s17 + $0x50] sm:$0xff]  ;;  %2290 = vset.pattern.permute.xlu0 %v2485_v34  ;;  %2291 = vset.pattern.permute.xlu1 %v2485_v34 }
  0xcc   : > { %v2101_v13 = vld [vmem:[%s2860_s17 + $0x8] sm:$0xff]  ;;  %v2100_v15 = vld [vmem:[%s2860_s17] sm:$0xff]  ;;  %v2123_v25 = vld [vmem:[%s2863_s29 + $0x38] sm:$0xff]  ;;  %2292 = vset.pattern.permute.xlu2 %v2485_v34 }
  0xcd   : > { %942 = vmatpush.bf16.msra.mxu0 %v2106_v3  ;;  %2151 = vmatpush.bf16.msra.mxu2 %v2106_v3  ;;  %v2109_v14 = vld [vmem:[%s2860_s17 + $0x48] sm:$0xff]  ;;  %v2108_v16 = vld [vmem:[%s2860_s17 + $0x40] sm:$0xff]  ;;  %v2131_v26 = vld [vmem:[%s2863_s29 + $0x78] sm:$0xff] }
  0xce   : > { %971 = vmatpush.bf16.msra.mxu1 %v2114_v4  ;;  %2159 = vmatpush.bf16.msra.mxu3 %v2114_v4  ;;  %v1855_v17 = vld [vmem:[%s2841_s10] sm:$0xf]  ;;  %v2093_v18 = vld [vmem:[%s2841_s10 + $0x4] sm:$0xf0]  ;;  %v2092_v21 = vld [vmem:[%s2841_s10 + $0x4] sm:$0xf] }
  0xcf   : > { %v1871_v19 = vld [vmem:[%s2841_s10 + $0x20] sm:$0xf]  ;;  %v2097_v20 = vld [vmem:[%s2841_s10 + $0x24] sm:$0xf0]  ;;  %v1857_v22 = vld [vmem:[%s2841_s10 + $0x8] sm:$0xf0]  ;;  %v2896_v27 = vor.u32 %v2093_v18, %v1855_v17 }
  0xd0   : > { %v2096_v23 = vld [vmem:[%s2841_s10 + $0x24] sm:$0xf]  ;;  %v1873_v24 = vld [vmem:[%s2841_s10 + $0x28] sm:$0xf0]  ;;  %v2898_v28 = vor.u32 %v2097_v20, %v1871_v19  ;;  %v2900_v29 = vor.u32 %v2092_v21, %v1857_v22  ;;  %v2122_v31 = vld [vmem:[%s2863_s29 + $0x30] sm:$0xff] }
  0xd1   : > { %943 = vmatpush.bf16.msra.mxu0 %v2105_v5  ;;  %2152 = vmatpush.bf16.msra.mxu2 %v2105_v5  ;;  %v2902_v30 = vor.u32 %v2096_v23, %v1873_v24  ;;  %v2130_v32 = vld [vmem:[%s2863_s29 + $0x70] sm:$0xff]  ;;  %v1353_v33 = vld [vmem:[%s2852_s5] sm:$0xff]  ;;  %v2121_v35 = vld [vmem:[%s2863_s29 + $0x28] sm:$0xff] }
  0xd2   : > { %972 = vmatpush.bf16.msra.mxu1 %v2113_v6  ;;  %2160 = vmatpush.bf16.msra.mxu3 %v2113_v6  ;;  %v2129_v36 = vld [vmem:[%s2863_s29 + $0x68] sm:$0xff]  ;;  %v2120_v37 = vld [vmem:[%s2863_s29 + $0x20] sm:$0xff]  ;;  %v1863_v39 = vld [vmem:[%s2841_s10 + $0x10] sm:$0xf] }
  0xd3   : > { %1363 = vperm.xlu0 %2290, %v1353_v33   ;;  %v2128_v38 = vld [vmem:[%s2863_s29 + $0x60] sm:$0xff]  ;;  %v2095_v40 = vld [vmem:[%s2841_s10 + $0x14] sm:$0xf0]  ;;  %v1879_v41 = vld [vmem:[%s2841_s10 + $0x30] sm:$0xf] }
  0xd4   : > { %v2099_v42 = vld [vmem:[%s2841_s10 + $0x34] sm:$0xf0]  ;;  %v2094_v43 = vld [vmem:[%s2841_s10 + $0x14] sm:$0xf]  ;;  %v1354_v44 = vld [vmem:[%s2852_s5 + $0x8] sm:$0xff]  ;;  %v1864_v50 = vor.u32 %v2095_v40, %v1863_v39 }
  0xd5   : > { %944 = vmatpush.bf16.msra.mxu0 %v2104_v7  ;;  %2153 = vmatpush.bf16.msra.mxu2 %v2104_v7  ;;  %v1865_v45 = vld [vmem:[%s2841_s10 + $0x18] sm:$0xf0]  ;;  %v2098_v46 = vld [vmem:[%s2841_s10 + $0x34] sm:$0xf]  ;;  %v1880_v51 = vor.u32 %v2099_v42, %v1879_v41  ;;  %v2117_v58 = vld [vmem:[%s2863_s29 + $0x8] sm:$0xff] }
  0xd6   : > { %973 = vmatpush.bf16.msra.mxu1 %v2112_v8  ;;  %2161 = vmatpush.bf16.msra.mxu3 %v2112_v8  ;;  %v1881_v47 = vld [vmem:[%s2841_s10 + $0x38] sm:$0xf0]  ;;  %v1868_v52 = vor.u32 %v2094_v43, %v1865_v45  ;;  %v2118_v54 = vld [vmem:[%s2863_s29 + $0x10] sm:$0xff]  ;;  %v2125_v59 = vld [vmem:[%s2863_s29 + $0x48] sm:$0xff] }
  0xd7   : > { %v2119_v48 = vld [vmem:[%s2863_s29 + $0x18] sm:$0xff]  ;;  %v1884_v53 = vor.u32 %v2098_v46, %v1881_v47  ;;  %v2126_v55 = vld [vmem:[%s2863_s29 + $0x50] sm:$0xff]  ;;  %v2116_v60 = vld [vmem:[%s2863_s29] sm:$0xff] }
  0xd8   : > { %v2127_v49 = vld [vmem:[%s2863_s29 + $0x58] sm:$0xff]  ;;  %v1355_v56 = vld [vmem:[%s2852_s5 + $0x10] sm:$0xff]  ;;  %v2124_v61 = vld [vmem:[%s2863_s29 + $0x40] sm:$0xff] }
  0xd9   : > { %945 = vmatpush.bf16.msra.mxu0 %v2103_v9  ;;  %2154 = vmatpush.bf16.msra.mxu2 %v2103_v9  ;;  %v1359_v57 = vld [vmem:[%s2852_s5 + $0x30] sm:$0xff]  ;;  %v1356_v62 = vld [vmem:[%s2852_s5 + $0x18] sm:$0xff]  ;;  %v1357_v0 = vld [vmem:[%s2852_s5 + $0x20] sm:$0xff] }
  0xda   : > { %974 = vmatpush.bf16.msra.mxu1 %v2111_v10  ;;  %2162 = vmatpush.bf16.msra.mxu3 %v2111_v10  ;;  %v1360_v63 = vld [vmem:[%s2852_s5 + $0x38] sm:$0xff]  ;;  %v1358_v1 = vld [vmem:[%s2852_s5 + $0x28] sm:$0xff]  ;;  %v2079_v2 = vld [vmem:[%s2857_s9 + $0x70] sm:$0xf] }
  0xdb   : > { %1368 = vperm.xlu0 %2290, %v1354_v44   ;;  %1373 = vperm.xlu1 %2291, %v1355_v56   ;;  %v2147_v3 = vld [vmem:[%s2857_s9 + $0x74] sm:$0xf0]  ;;  %v2146_v4 = vld [vmem:[%s2857_s9 + $0x74] sm:$0xf]  ;;  %v2081_v6 = vld [vmem:[%s2857_s9 + $0x78] sm:$0xf0] }
  0xdc   : > { %1383 = vperm.xlu2 %2292, %v1357_v0   ;;  %v2080_v5 = vor.u32 %v2147_v3, %v2079_v2  ;;  %v2084_v7 = vor.u32 %v2146_v4, %v2081_v6  ;;  %v2071_v9 = vld [vmem:[%s2857_s9 + $0x60] sm:$0xf]  ;;  %v2145_v10 = vld [vmem:[%s2857_s9 + $0x64] sm:$0xf0]  ;;  %v2063_v18 = vld [vmem:[%s2857_s9 + $0x50] sm:$0xf] }
  0xdd   : > { %946 = vmatpush.bf16.msra.mxu0 %v2102_v11  ;;  %2155 = vmatpush.bf16.msra.mxu2 %v2102_v11  ;;  %v2144_v11 = vld [vmem:[%s2857_s9 + $0x64] sm:$0xf]  ;;  %v2143_v19 = vld [vmem:[%s2857_s9 + $0x54] sm:$0xf0]  ;;  %v2142_v21 = vld [vmem:[%s2857_s9 + $0x54] sm:$0xf] }
  0xde   : > { %975 = vmatpush.bf16.msra.mxu1 %v2110_v12  ;;  %2163 = vmatpush.bf16.msra.mxu3 %v2110_v12  ;;  %v2064_v20 = vor.u32 %v2143_v19, %v2063_v18  ;;  %v2065_v22 = vld [vmem:[%s2857_s9 + $0x58] sm:$0xf0]  ;;  %v2138_v41 = vld [vmem:[%s2857_s9 + $0x34] sm:$0xf]  ;;  %v2039_v47 = vld [vmem:[%s2857_s9 + $0x20] sm:$0xf] }
  0xdf   : > { %v2068_v24 = vor.u32 %v2142_v21, %v2065_v22  ;;  %v2049_v42 = vld [vmem:[%s2857_s9 + $0x38] sm:$0xf0]  ;;  %v2023_v4 = vld [vmem:[%s2857_s9] sm:$0xf] }
  0xe0   : > { %v2052_v44 = vor.u32 %v2138_v41, %v2049_v42 }
  0xe1   : > { %947 = vmatpush.bf16.msra.mxu0 %v2101_v13  ;;  %2156 = vmatpush.bf16.msra.mxu2 %v2101_v13  ;;  %v2072_v13 = vor.u32 %v2145_v10, %v2071_v9  ;;  %v2132_v9 = vld [vmem:[%s2857_s9 + $0x4] sm:$0xf] }
  0xe2   : > { %976 = vmatpush.bf16.msra.mxu1 %v2109_v14  ;;  %2164 = vmatpush.bf16.msra.mxu3 %v2109_v14  ;;  %v2073_v14 = vld [vmem:[%s2857_s9 + $0x68] sm:$0xf0] }
  0xe3   : > { %1393 = vperm.xlu0 %2290, %v1359_v57   ;;  %1378 = vperm.xlu1 %2291, %v1356_v62   ;;  %v2031_v57 = vld [vmem:[%s2857_s9 + $0x10] sm:$0xf] }
  0xe4   : > { %1388 = vperm.xlu2 %2292, %v1358_v1  }
  0xe5   : > { %948 = vmatpush.bf16.msra.mxu0 %v2100_v15  ;;  %2157 = vmatpush.bf16.msra.mxu2 %v2100_v15 }
  0xe6   : > { %977 = vmatpush.bf16.msra.mxu1 %v2108_v16  ;;  %2165 = vmatpush.bf16.msra.mxu3 %v2108_v16  ;;  %v2076_v16 = vor.u32 %v2144_v11, %v2073_v14 }
  0xe8   : > { %949 = vmatmul.bf16.vlgmr.msra.gmra.mxu0 %v2896_v27  ;;  %959 = vmatmul.bf16.vlgmr.msra.gmra.mxu2 %v2898_v28 }
  0xe9   : > { %1127 = vmatpush.bf16.msrb.mxu2 %v2123_v25  ;;  %978 = vmatmul.bf16.vlgmr.msra.gmra.mxu1 %v2900_v29 }
  0xea   : > { %1156 = vmatpush.bf16.msrb.mxu3 %v2131_v26  ;;  %1525 = vmatpush.bf16.msrb.mxu0 %v2080_v5 }
  0xeb   : > { %988 = vmatmul.bf16.vlgmr.msra.gmra.mxu3 %v2902_v30  ;;  %1398 = vperm.xlu1 %2291, %v1360_v63   ;;  %v2033_v63 = vld [vmem:[%s2857_s9 + $0x18] sm:$0xf0] }
  0xec   : > { %1554 = vmatpush.bf16.msrb.mxu1 %v2084_v7 }
  0xed   : > { %1128 = vmatpush.bf16.msrb.mxu2 %v2122_v31 }
  0xee   : > { %1157 = vmatpush.bf16.msrb.mxu3 %v2130_v32  ;;  %1526 = vmatpush.bf16.msrb.mxu0 %v2072_v13  ;;  %v2057_v32 = vld [vmem:[%s2857_s9 + $0x48] sm:$0xf0] }
  0xf0   : > { %1555 = vmatpush.bf16.msrb.mxu1 %v2076_v16 }
  0xf1   : > { %1129 = vmatpush.bf16.msrb.mxu2 %v2121_v35 }
  0xf2   : > { %1158 = vmatpush.bf16.msrb.mxu3 %v2129_v36  ;;  %1527 = vmatpush.bf16.msrb.mxu0 %v2064_v20 }
  0xf4   : > { %1556 = vmatpush.bf16.msrb.mxu1 %v2068_v24 }
  0xf5   : > { %1130 = vmatpush.bf16.msrb.mxu2 %v2120_v37  ;;  %v2047_v37 = vld [vmem:[%s2857_s9 + $0x30] sm:$0xf] }
  0xf6   : > { %1159 = vmatpush.bf16.msrb.mxu3 %v2128_v38  ;;  %v2139_v38 = vld [vmem:[%s2857_s9 + $0x34] sm:$0xf0] }
  0xf7   : > { %v2048_v40 = vor.u32 %v2139_v38, %v2047_v37 }
  0xf8   : > { %954 = vmatmul.bf16.gmra.mxu0 %v1864_v50  ;;  %964 = vmatmul.bf16.gmra.mxu2 %v1880_v51 }
  0xf9   : > { %1131 = vmatpush.bf16.msrb.mxu2 %v2119_v48  ;;  %983 = vmatmul.bf16.gmra.mxu1 %v1868_v52  ;;  %v2137_v48 = vld [vmem:[%s2857_s9 + $0x24] sm:$0xf0] }
  0xfa   : > { %1160 = vmatpush.bf16.msrb.mxu3 %v2127_v49  ;;  %v2136_v49 = vld [vmem:[%s2857_s9 + $0x24] sm:$0xf] }
  0xfb   : > { %993 = vmatmul.bf16.gmra.mxu3 %v1884_v53 }
  0xfd   : > { %1132 = vmatpush.bf16.msrb.mxu2 %v2118_v54 }
  0xfe   : > { %1161 = vmatpush.bf16.msrb.mxu3 %v2126_v55 }
 0x101   : > { %1133 = vmatpush.bf16.msrb.mxu2 %v2117_v58  ;;  %v2135_v58 = vld [vmem:[%s2857_s9 + $0x14] sm:$0xf0] }
 0x102   : > { %1162 = vmatpush.bf16.msrb.mxu3 %v2125_v59  ;;  %v2134_v59 = vld [vmem:[%s2857_s9 + $0x14] sm:$0xf]  ;;  %v2032_v1 = vor.u32 %v2135_v58, %v2031_v57 }
 0x103   : > { %v2036_v2 = vor.u32 %v2134_v59, %v2033_v63 }
 0x105   : > { %1134 = vmatpush.bf16.msrb.mxu2 %v2116_v60 }
 0x106   : > { %1163 = vmatpush.bf16.msrb.mxu3 %v2124_v61 }
 0x108   : > { %1135 = vmatmul.bf16.vlgmr.msrb.gmra.mxu2 %v2896_v27  ;;  %v2055_v27 = vld [vmem:[%s2857_s9 + $0x40] sm:$0xf] }
 0x10b   : > { %1164 = vmatmul.bf16.vlgmr.msrb.gmra.mxu3 %v2900_v29  ;;  %v2140_v29 = vld [vmem:[%s2857_s9 + $0x44] sm:$0xf] }
 0x10c   : > { %v2060_v34 = vor.u32 %v2140_v29, %v2057_v32 }
 0x10e   : > { %1557 = vmatpush.bf16.msrb.mxu1 %v2060_v34 }
 0x112   : > { %1558 = vmatpush.bf16.msrb.mxu1 %v2052_v44 }
 0x118   : > { %1140 = vmatmul.bf16.gmra.mxu2 %v1864_v50 }
 0x11b   : > { %1169 = vmatmul.bf16.gmra.mxu3 %v1868_v52  ;;  %v2041_v52 = vld [vmem:[%s2857_s9 + $0x28] sm:$0xf0] }
 0x11c   : > { %v2044_v54 = vor.u32 %v2136_v49, %v2041_v52 }
 0x11e   : > { %1559 = vmatpush.bf16.msrb.mxu1 %v2044_v54 }
 0x122   : > { %1560 = vmatpush.bf16.msrb.mxu1 %v2036_v2 }
 0x128   : > { %1145 = vmatmul.bf16.gmra.mxu2 %v2898_v28  ;;  %v2141_v28 = vld [vmem:[%s2857_s9 + $0x44] sm:$0xf0] }
 0x129   : > { %v2056_v31 = vor.u32 %v2141_v28, %v2055_v27 }
 0x12b   : > { %1174 = vmatmul.bf16.gmra.mxu3 %v2902_v30  ;;  %1528 = vmatpush.bf16.msrb.mxu0 %v2056_v31 }
 0x12f   : > { %1529 = vmatpush.bf16.msrb.mxu0 %v2048_v40 }
 0x138   : > { %1150 = vmatmul.bf16.gmra.mxu2 %v1880_v51  ;;  %v2040_v51 = vor.u32 %v2137_v48, %v2039_v47 }
 0x13a   : > { %1530 = vmatpush.bf16.msrb.mxu0 %v2040_v51 }
 0x13b   : > { %1179 = vmatmul.bf16.gmra.mxu3 %v1884_v53 }
 0x13e   : > { %1531 = vmatpush.bf16.msrb.mxu0 %v2032_v1 }
 0x145   : > { %v1364_v49 = vpop.permute.xlu0 %1363 }
 0x165   : > { %v950_v8 = vpop.f32.mrf.mxu0 }
 0x166   : > { %v979_v12 = vpop.f32.mrf.mxu1 }
 0x167   : > { %v2950_v15 = vadd.f32 %v979_v12, %v950_v8  ;;  %v2133_v8 = vld [vmem:[%s2857_s9 + $0x4] sm:$0xf0]  ;;  %v2025_v12 = vld [vmem:[%s2857_s9 + $0x8] sm:$0xf0] }
 0x168   : > { %v2024_v11 = vor.u32 %v2133_v8, %v2023_v4  ;;  %v2028_v13 = vor.u32 %v2132_v9, %v2025_v12 }
 0x169   : > { %v2013_v17 = vmul.f32 -1.442695, %v2950_v15 }
 0x16a   : > { %1532 = vmatpush.bf16.msrb.mxu0 %v2024_v11  ;;  %1561 = vmatpush.bf16.msrb.mxu1 %v2028_v13  ;;  %v1369_v11 = vpop.permute.xlu0 %1368 }
 0x16b   : > { %2293 = vpow2.f32 %v2013_v17  ;;  %v960_v23 = vpop.f32.mrf.mxu2 }
 0x16d   : > { %v952_v26 = vpop.f32.mrf.mxu0 }
 0x16e   : > { %v989_v25 = vpop.f32.mrf.mxu3  ;;  %v981_v30 = vpop.f32.mrf.mxu1 }
 0x16f   : > { %v2961_v33 = vadd.f32 %v981_v30, %v952_v26  ;;  %v2990_v6 = vadd.f32 %v989_v25, %v960_v23 }
 0x171   : > { %v2294_v35 = vpop.eup %2293  ;;  %v2014_v36 = vmul.f32 -1.442695, %v2961_v33  ;;  %v2017_v18 = vmul.f32 -1.442695, %v2990_v6 }
 0x172   : > { %v2966_v39 = vadd.f32 1.0, %v2294_v35 }
 0x173   : > { %2295 = vpow2.f32 %v2014_v36  ;;  %v962_v43 = vpop.f32.mrf.mxu2 }
 0x174   : > { %2297 = vrcp.f32 %v2966_v39  ;;  %vm1222_vm0 = vweird.f32 %v2966_v39  ;;  %v1228_v31 = vand.u32 2147483648, %v2966_v39  ;;  %v1226_v35 = vand.u32 2147483647, %v2966_v39 }
 0x175   : > { %v955_v46 = vpop.f32.mrf.mxu0 }
 0x176   : > { %v991_v45 = vpop.f32.mrf.mxu3  ;;  %v984_v50 = vpop.f32.mrf.mxu1  ;;  %vm1227_vm6 = vcmp.eq.f32.partialorder %v1226_v35, 8.507059e+37 }
 0x177   : > { %v2975_v53 = vadd.f32 %v984_v50, %v955_v46  ;;  %v2997_v16 = vadd.f32 %v991_v45, %v962_v43  ;;  %v1229_v46 = vor.u32 1.1754944e-38, %v1228_v31 }
 0x179   : > { %v2296_v55 = vpop.eup %2295  ;;  %v2015_v56 = vmul.f32 -1.442695, %v2975_v53  ;;  %v2018_v25 = vmul.f32 -1.442695, %v2997_v16 }
 0x17a   : > { %v2981_v60 = vpop.eup %2297  ;;  %v2983_v61 = vadd.f32 1.0, %v2296_v55 }
 0x17b   : > { %2299 = vpow2.f32 %v2015_v56  ;;  %v965_v62 = vpop.f32.mrf.mxu2  ;;  %v1218_v5 = vmul.f32 %v2981_v60, %v2966_v39  ;;  %vm1223_vm1 = vweird.f32 %v2981_v60 }
 0x17c   : > { %2301 = vrcp.f32 %v2983_v61  ;;  %vm3014_vm3 = vmor %vm1222_vm0, %vm1223_vm1  ;;  %v1243_v41 = vand.u32 2147483648, %v2983_v61  ;;  %vm1237_vm4 = vweird.f32 %v2983_v61  ;;  %v1241_v39 = vand.u32 2147483647, %v2983_v61 }
 0x17d   : > { %v957_v3 = vpop.f32.mrf.mxu0  ;;  %v1219_v17 = vsub.f32 1.0, %v1218_v5 }
 0x17e   : > { %v994_v0 = vpop.f32.mrf.mxu3  ;;  %v986_v7 = vpop.f32.mrf.mxu1  ;;  %v1244_v52 = vor.u32 1.1754944e-38, %v1243_v41  ;;  %vm1242_vm7 = vcmp.eq.f32.partialorder %v1241_v39, 8.507059e+37 }
 0x17f   : > { %v2994_v10 = vadd.f32 %v986_v7, %v957_v3  ;;  %v1220_v26 = vmul.f32 %v2981_v60, %v1219_v17  ;;  %v3030_v48 = vadd.f32 %v994_v0, %v965_v62 }
 0x181   : > { %v2300_v14 = vpop.eup %2299  ;;  %v2016_v21 = vmul.f32 -1.442695, %v2994_v10  ;;  %v1221_v29 = vadd.f32 %v2981_v60, %v1220_v26  ;;  %v2019_v59 = vmul.f32 -1.442695, %v3030_v48 }
 0x182   : > { %v2302_v19 = vpop.eup %2301  ;;  %v3000_v20 = vadd.f32 1.0, %v2300_v14 }
 0x183   : > { %v967_v22 = vpop.f32.mrf.mxu2  ;;  %v1233_v23 = vmul.f32 %v2302_v19, %v2983_v61  ;;  %vm1238_vm2 = vweird.f32 %v2302_v19  ;;  %v1225_v43 = vsel %vm3014_vm3, %v2981_v60, %v1221_v29 }
 0x184   : > { %2303 = vrcp.f32 %v3000_v20  ;;  %vm1239_vm5 = vmor %vm1237_vm4, %vm1238_vm2  ;;  %v1230_v51 = vsel %vm1227_vm6, %v1229_v46, %v1225_v43  ;;  %vm1252_vm8 = vweird.f32 %v3000_v20  ;;  %v1256_v14 = vand.u32 2147483647, %v3000_v20 }
 0x185   : > { %2305 = vpow2.f32 %v2017_v18  ;;  %v1234_v27 = vsub.f32 1.0, %v1233_v23  ;;  %v1337_v61 = vmul.f32 %v1230_v51, %v2950_v15 }
 0x186   : > { %v996_v24 = vpop.f32.mrf.mxu3  ;;  %2307 = vpow2.f32 %v2016_v21  ;;  %vm1257_vm14 = vcmp.eq.f32.partialorder %v1256_v14, 8.507059e+37 }
 0x187   : > { %v1235_v28 = vmul.f32 %v2302_v19, %v1234_v27  ;;  %2309 = vpow2.f32 %v2018_v25  ;;  %v3033_v55 = vadd.f32 %v996_v24, %v967_v22 }
 0x189   : > { %v1236_v36 = vadd.f32 %v2302_v19, %v1235_v28  ;;  %v2020_v0 = vmul.f32 -1.442695, %v3033_v55 }
 0x18a   : > { %v3010_v30 = vpop.eup %2303 }
 0x18b   : > { %v1136_v32 = vpop.f32.mrf.mxu2  ;;  %v2306_v34 = vpop.eup %2305  ;;  %v1248_v42 = vmul.f32 %v3010_v30, %v3000_v20  ;;  %v1240_v50 = vsel %vm1239_vm5, %v2302_v19, %v1236_v36  ;;  %vm1253_vm9 = vweird.f32 %v3010_v30 }
 0x18c   : > { %v2308_v38 = vpop.eup %2307  ;;  %v3028_v47 = vadd.f32 1.0, %v2306_v34  ;;  %v1245_v58 = vsel %vm1242_vm7, %v1244_v52, %v1240_v50  ;;  %vm3058_vm11 = vmor %vm1252_vm8, %vm1253_vm9 }
 0x18d   : > { %v3026_v44 = vadd.f32 1.0, %v2308_v38  ;;  %v2310_v45 = vpop.eup %2309  ;;  %v1249_v54 = vsub.f32 1.0, %v1248_v42  ;;  %v1338_v2 = vmul.f32 %v1245_v58, %v2961_v33  ;;  %v1258_v33 = vand.u32 2147483648, %v3000_v20  ;;  %v1374_v20 = vpop.permute.xlu1 %1373 }
 0x18e   : > { %v1165_v37 = vpop.f32.mrf.mxu3  ;;  %v3035_v56 = vadd.f32 1.0, %v2310_v45  ;;  %vm1282_vm1 = vweird.f32 %v3028_v47 }
 0x18f   : > { %2311 = vrcp.f32 %v3026_v44  ;;  %v1166_v57 = vadd.f32 %v1165_v37, %v1136_v32  ;;  %v1250_v63 = vmul.f32 %v3010_v30, %v1249_v54  ;;  %v1273_v23 = vand.u32 2147483648, %v3026_v44 }
 0x190   : > { %2313 = vrcp.f32 %v3028_v47  ;;  %vm1267_vm12 = vweird.f32 %v3026_v44  ;;  %v1271_v29 = vand.u32 2147483647, %v3026_v44  ;;  %v1259_v31 = vor.u32 1.1754944e-38, %v1258_v33 }
 0x191   : > { %2315 = vrcp.f32 %v3035_v56  ;;  %v1345_v3 = vmul.f32 %v1337_v61, %v1166_v57  ;;  %v1251_v15 = vadd.f32 %v3010_v30, %v1250_v63  ;;  %v1286_v61 = vand.u32 2147483647, %v3028_v47 }
 0x192   : > { %2317 = vpow2.f32 %v2019_v59  ;;  %vm1272_vm15 = vcmp.eq.f32.partialorder %v1271_v29, 8.507059e+37  ;;  %vm1297_vm4 = vweird.f32 %v3035_v56 }
 0x193   : > { %v1138_v60 = vpop.f32.mrf.mxu2  ;;  %2319 = vpow2.f32 %v2020_v0  ;;  %v1401_v12 = vmul.f32 %v1364_v49, %v1345_v3  ;;  %v1255_v27 = vsel %vm3058_vm11, %v3010_v30, %v1251_v15  ;;  %v1274_v30 = vor.u32 1.1754944e-38, %v1273_v23 }
 0x194   : > { %v1260_v36 = vsel %vm1257_vm14, %v1259_v31, %v1255_v27  ;;  %v1303_v3 = vand.u32 2147483648, %v3035_v56  ;;  %vm1287_vm6 = vcmp.eq.f32.partialorder %v1286_v61, 8.507059e+37  ;;  %v1410_v61 = vld [vmem:[#allocation2] sm:$0xff] }
 0x195   : > { %v2312_v1 = vpop.eup %2311  ;;  %v1339_v39 = vmul.f32 %v1260_v36, %v2975_v53  ;;  %v1379_v57 = vpop.permute.xlu1 %1378 }
 0x196   : > { %v1167_v62 = vpop.f32.mrf.mxu3  ;;  %v1263_v5 = vmul.f32 %v2312_v1, %v3026_v44  ;;  %v3046_v8 = vpop.eup %2313  ;;  %vm1268_vm10 = vweird.f32 %v2312_v1 }
 0x197   : > { %v1168_v4 = vadd.f32 %v1167_v62, %v1138_v60  ;;  %v3052_v19 = vpop.eup %2315  ;;  %v1278_v21 = vmul.f32 %v3046_v8, %v3028_v47  ;;  %vm1269_vm13 = vmor %vm1267_vm12, %vm1268_vm10  ;;  %vm1283_vm0 = vweird.f32 %v3046_v8 }
 0x198   : > { %v1264_v9 = vsub.f32 1.0, %v1263_v5  ;;  %v2318_v26 = vpop.eup %2317  ;;  %v1293_v34 = vmul.f32 %v3052_v19, %v3035_v56  ;;  %vm1298_vm2 = vweird.f32 %v3052_v19  ;;  %vm3089_vm3 = vmor %vm1282_vm1, %vm1283_vm0 }
 0x199   : > { %v1346_v7 = vmul.f32 %v1338_v2, %v1168_v4  ;;  %v2320_v32 = vpop.eup %2319  ;;  %v3070_v37 = vadd.f32 1.0, %v2318_v26  ;;  %v1279_v38 = vsub.f32 1.0, %v1278_v21  ;;  %vm1299_vm5 = vmor %vm1297_vm4, %vm1298_vm2 }
 0x19a   : > { %v1265_v17 = vmul.f32 %v2312_v1, %v1264_v9  ;;  %v3072_v42 = vadd.f32 1.0, %v2320_v32  ;;  %v1294_v43 = vsub.f32 1.0, %v1293_v34  ;;  %v1384_v9 = vpop.permute.xlu2 %1383 }
 0x19b   : > { %v1402_v13 = vmul.f32 %v1369_v11, %v1346_v7  ;;  %v1141_v18 = vpop.f32.mrf.mxu2  ;;  %2321 = vrcp.f32 %v3070_v37  ;;  %v1280_v46 = vmul.f32 %v3046_v8, %v1279_v38  ;;  %vm1312_vm9 = vweird.f32 %v3070_v37 }
 0x19c   : > { %v1266_v28 = vadd.f32 %v2312_v1, %v1265_v17  ;;  %2323 = vrcp.f32 %v3072_v42  ;;  %v1295_v52 = vmul.f32 %v3052_v19, %v1294_v43  ;;  %v1316_v32 = vand.u32 2147483647, %v3070_v37 }
 0x19d   : > { %v1425_v25 = vpack.c.bf16 %v1402_v13, %v1401_v12  ;;  %v1281_v58 = vadd.f32 %v3046_v8, %v1280_v46  ;;  %v1304_v13 = vor.u32 1.1754944e-38, %v1303_v3  ;;  %v1333_v36 = vand.u32 2147483648, %v3072_v42 }
 0x19e   : > { %v1170_v24 = vpop.f32.mrf.mxu3  ;;  %v1270_v35 = vsel %vm1269_vm13, %v2312_v1, %v1266_v28  ;;  %v1296_v62 = vadd.f32 %v3052_v19, %v1295_v52  ;;  %vm1327_vm12 = vweird.f32 %v3072_v42  ;;  %vm1317_vm14 = vcmp.eq.f32.partialorder %v1316_v32, 8.507059e+37 }
 0x19f   : > { %1533 = vmatmul.bf16.vlgmr.msrb.gmra.mxu0 %v1425_v25  ;;  %1562 = vmatmul.bf16.vlgmr.msrb.gmra.mxu1 %v1425_v25  ;;  %v1171_v40 = vadd.f32 %v1170_v24, %v1141_v18  ;;  %v1275_v41 = vsel %vm1272_vm15, %v1274_v30, %v1270_v35  ;;  %v1285_v5 = vsel %vm3089_vm3, %v3046_v8, %v1281_v58  ;;  %v1399_v58 = vpop.permute.xlu1 %1398 }
 0x1a0   : > { %v1340_v49 = vmul.f32 %v1275_v41, %v2994_v10  ;;  %v1288_v10 = vand.u32 2147483648, %v3028_v47  ;;  %v1301_v47 = vand.u32 2147483647, %v3035_v56  ;;  %v1300_v11 = vsel %vm1299_vm5, %v3052_v19, %v1296_v62 }
 0x1a1   : > { %v1347_v50 = vmul.f32 %v1339_v39, %v1171_v40  ;;  %v3082_v60 = vpop.eup %2321  ;;  %v1331_v40 = vand.u32 2147483647, %v3072_v42  ;;  %v1334_v39 = vor.u32 1.1754944e-38, %v1333_v36  ;;  %v1423_v36 = vld [vmem:[#allocation2 + $0x78] sm:$0xff] }
 0x1a2   : > { %v2324_v1 = vpop.eup %2323  ;;  %v1308_v7 = vmul.f32 %v3082_v60, %v3070_v37  ;;  %v1289_v15 = vor.u32 1.1754944e-38, %v1288_v10  ;;  %vm1302_vm7 = vcmp.eq.f32.partialorder %v1301_v47, 8.507059e+37  ;;  %v1389_v28 = vpop.permute.xlu2 %1388  ;;  %vm1313_vm8 = vweird.f32 %v3082_v60  ;;  %v1409_v10 = vld [vmem:[#allocation2 + $0x30] sm:$0xff] }
 0x1a3   : > { %v1143_v44 = vpop.f32.mrf.mxu2  ;;  %v1403_v53 = vmul.f32 %v1374_v20, %v1347_v50  ;;  %v1323_v33 = vmul.f32 %v2324_v1, %v3072_v42  ;;  %v1305_v17 = vsel %vm1302_vm7, %v1304_v13, %v1300_v11  ;;  %vm1328_vm10 = vweird.f32 %v2324_v1  ;;  %vm1314_vm11 = vmor %vm1312_vm9, %vm1313_vm8  ;;  %v1413_v47 = vld [vmem:[#allocation2 + $0x50] sm:$0xff]  ;;  %v1416_v13 = vld [vmem:[#allocation2 + $0x48] sm:$0xff] }
 0x1a4   : > { %v1290_v12 = vsel %vm1287_vm6, %v1289_v15, %v1285_v5  ;;  %v1309_v8 = vsub.f32 1.0, %v1308_v7  ;;  %v1342_v23 = vmul.f32 %v1305_v17, %v2997_v16  ;;  %vm1329_vm13 = vmor %vm1327_vm12, %vm1328_vm10  ;;  %vm1332_vm15 = vcmp.eq.f32.partialorder %v1331_v40, 8.507059e+37  ;;  %v1414_v7 = vld [vmem:[#allocation2 + $0x68] sm:$0xff] }
 0x1a5   : > { %v1341_v56 = vmul.f32 %v1290_v12, %v2990_v6  ;;  %v1324_v18 = vsub.f32 1.0, %v1323_v33  ;;  %v1318_v6 = vand.u32 2147483648, %v3070_v37  ;;  %v1415_v12 = vld [vmem:[#allocation2 + $0x8] sm:$0xff] }
 0x1a6   : > { %v1172_v45 = vpop.f32.mrf.mxu3  ;;  %v1310_v24 = vmul.f32 %v3082_v60, %v1309_v8 }
 0x1a7   : > { %v1173_v51 = vadd.f32 %v1172_v45, %v1143_v44  ;;  %v1325_v19 = vmul.f32 %v2324_v1, %v1324_v18  ;;  %v1319_v41 = vor.u32 1.1754944e-38, %v1318_v6  ;;  %v1417_v18 = vld [vmem:[#allocation2 + $0x40] sm:$0xff]  ;;  %v1422_v6 = vld [vmem:[#allocation2 + $0x70] sm:$0xff] }
 0x1a8   : > { %v1311_v29 = vadd.f32 %v3082_v60, %v1310_v24 }
 0x1a9   : > { %v1348_v54 = vmul.f32 %v1340_v49, %v1173_v51  ;;  %v1326_v16 = vadd.f32 %v2324_v1, %v1325_v19  ;;  %v1420_v19 = vld [vmem:[#allocation2 + $0x38] sm:$0xff] }
 0x1aa   : > { %v1315_v38 = vsel %vm1314_vm11, %v3082_v60, %v1311_v29 }
 0x1ab   : > { %v1404_v59 = vmul.f32 %v1379_v57, %v1348_v54  ;;  %v1146_v63 = vpop.f32.mrf.mxu2  ;;  %v1330_v37 = vsel %vm1329_vm13, %v2324_v1, %v1326_v16  ;;  %v1320_v43 = vsel %vm1317_vm14, %v1319_v41, %v1315_v38  ;;  %v1394_v57 = vpop.permute.xlu0 %1393  ;;  %v1411_v1 = vld [vmem:[#allocation2 + $0x58] sm:$0xff] }
 0x1ac   : > { %v1335_v45 = vsel %vm1332_vm15, %v1334_v39, %v1330_v37  ;;  %v1343_v46 = vmul.f32 %v1320_v43, %v3030_v48 }
 0x1ad   : > { %v1426_v0 = vpack.c.bf16 %v1404_v59, %v1403_v53  ;;  %v1344_v51 = vmul.f32 %v1335_v45, %v3033_v55  ;;  %v1412_v55 = vld [vmem:[#allocation2 + $0x18] sm:$0xff] }
 0x1ae   : > { %v1175_v4 = vpop.f32.mrf.mxu3 }
 0x1af   : > { %1538 = vmatmul.bf16.gmra.mxu0 %v1426_v0  ;;  %1567 = vmatmul.bf16.gmra.mxu1 %v1426_v0  ;;  %v1176_v14 = vadd.f32 %v1175_v4, %v1146_v63 }
 0x1b1   : > { %v1349_v25 = vmul.f32 %v1341_v56, %v1176_v14 }
 0x1b3   : > { %v1148_v21 = vpop.f32.mrf.mxu2  ;;  %v1405_v31 = vmul.f32 %v1384_v9, %v1349_v25 }
 0x1b6   : > { %v1177_v22 = vpop.f32.mrf.mxu3 }
 0x1b7   : > { %v1178_v26 = vadd.f32 %v1177_v22, %v1148_v21  ;;  %v1418_v21 = vld [vmem:[#allocation2 + $0x20] sm:$0xff] }
 0x1b9   : > { %v1350_v27 = vmul.f32 %v1342_v23, %v1178_v26  ;;  %v1419_v26 = vld [vmem:[#allocation2 + $0x10] sm:$0xff] }
 0x1bb   : > { %v1406_v20 = vmul.f32 %v1389_v28, %v1350_v27  ;;  %v1151_v34 = vpop.f32.mrf.mxu2 }
 0x1bd   : > { %v1427_v35 = vpack.c.bf16 %v1406_v20, %v1405_v31  ;;  %v1421_v20 = vld [vmem:[#allocation2 + $0x60] sm:$0xff] }
 0x1be   : > { %v1180_v30 = vpop.f32.mrf.mxu3 }
 0x1bf   : > { %1543 = vmatmul.bf16.gmra.mxu0 %v1427_v35  ;;  %1572 = vmatmul.bf16.gmra.mxu1 %v1427_v35  ;;  %v1181_v44 = vadd.f32 %v1180_v30, %v1151_v34  ;;  %v1424_v30 = vld [vmem:[#allocation2 + $0x28] sm:$0xff] }
 0x1c1   : > { %v1351_v52 = vmul.f32 %v1343_v46, %v1181_v44 }
 0x1c3   : > { %v1153_v49 = vpop.f32.mrf.mxu2  ;;  %v1407_v53 = vmul.f32 %v1394_v57, %v1351_v52 }
 0x1c6   : > { %v1182_v50 = vpop.f32.mrf.mxu3 }
 0x1c7   : > { %v1183_v54 = vadd.f32 %v1182_v50, %v1153_v49 }
 0x1c9   : > { %v1352_v42 = vmul.f32 %v1344_v51, %v1183_v54 }
 0x1cb   : > { %v1408_v59 = vmul.f32 %v1399_v58, %v1352_v42 }
 0x1cd   : > { %v1428_v60 = vpack.c.bf16 %v1408_v59, %v1407_v53 }
 0x1cf   : > { %1548 = vmatmul.bf16.gmra.mxu0 %v1428_v60  ;;  %1577 = vmatmul.bf16.gmra.mxu1 %v1428_v60 }
 0x21c   : > { %v1534_v62 = vpop.f32.mrf.mxu0  ;;  %v1563_v63 = vpop.f32.mrf.mxu1 }
 0x21d   : > { %v1583_v0 = vadd.f32 %v1534_v62, %v1409_v10  ;;  %v1584_v48 = vadd.f32 %v1563_v63, %v1410_v61 }
 0x21f   : > { %1599 = vst [vmem:[#allocation2 + $0x30] sm:$0xff] %v1583_v0 }
 0x220   : > { %1600 = vst [vmem:[#allocation2] sm:$0xff] %v1584_v48 }
 0x224   : > { %v1536_v2 = vpop.f32.mrf.mxu0  ;;  %v1565_v3 = vpop.f32.mrf.mxu1 }
 0x225   : > { %v1585_v4 = vadd.f32 %v1536_v2, %v1411_v1  ;;  %v1586_v5 = vadd.f32 %v1565_v3, %v1412_v55 }
 0x227   : > { %1601 = vst [vmem:[#allocation2 + $0x58] sm:$0xff] %v1585_v4 }
 0x228   : > { %1602 = vst [vmem:[#allocation2 + $0x18] sm:$0xff] %v1586_v5 }
 0x22c   : > { %v1539_v15 = vpop.f32.mrf.mxu0  ;;  %v1568_v9 = vpop.f32.mrf.mxu1 }
 0x22d   : > { %v1587_v11 = vadd.f32 %v1539_v15, %v1413_v47  ;;  %v1588_v33 = vadd.f32 %v1568_v9, %v1414_v7 }
 0x22f   : > { %1603 = vst [vmem:[#allocation2 + $0x50] sm:$0xff] %v1587_v11 }
 0x230   : > { %1604 = vst [vmem:[#allocation2 + $0x68] sm:$0xff] %v1588_v33 }
 0x234   : > { %v1541_v8 = vpop.f32.mrf.mxu0  ;;  %v1570_v14 = vpop.f32.mrf.mxu1 }
 0x235   : > { %v1589_v17 = vadd.f32 %v1541_v8, %v1415_v12  ;;  %v1590_v56 = vadd.f32 %v1570_v14, %v1416_v13 }
 0x237   : > { %1605 = vst [vmem:[#allocation2 + $0x8] sm:$0xff] %v1589_v17 }
 0x238   : > { %1606 = vst [vmem:[#allocation2 + $0x48] sm:$0xff] %v1590_v56 }
 0x23c   : > { %v1544_v22 = vpop.f32.mrf.mxu0  ;;  %v1573_v23 = vpop.f32.mrf.mxu1 }
 0x23d   : > { %v1591_v24 = vadd.f32 %v1544_v22, %v1417_v18  ;;  %v1592_v25 = vadd.f32 %v1573_v23, %v1418_v21 }
 0x23f   : > { %1607 = vst [vmem:[#allocation2 + $0x40] sm:$0xff] %v1591_v24 }
 0x240   : > { %1608 = vst [vmem:[#allocation2 + $0x20] sm:$0xff] %v1592_v25 }
 0x244   : > { %v1546_v27 = vpop.f32.mrf.mxu0  ;;  %v1575_v28 = vpop.f32.mrf.mxu1 }
 0x245   : > { %v1593_v29 = vadd.f32 %v1546_v27, %v1419_v26  ;;  %v1594_v31 = vadd.f32 %v1575_v28, %v1420_v19 }
 0x247   : > { %1609 = vst [vmem:[#allocation2 + $0x10] sm:$0xff] %v1593_v29 }
 0x248   : > { %1610 = vst [vmem:[#allocation2 + $0x38] sm:$0xff] %v1594_v31 }
 0x24c   : > { %v1549_v32 = vpop.f32.mrf.mxu0  ;;  %v1578_v16 = vpop.f32.mrf.mxu1 }
 0x24d   : > { %v1595_v34 = vadd.f32 %v1549_v32, %v1421_v20  ;;  %v1596_v35 = vadd.f32 %v1578_v16, %v1422_v6 }
 0x24f   : > { %1611 = vst [vmem:[#allocation2 + $0x60] sm:$0xff] %v1595_v34 }
 0x250   : > { %1612 = vst [vmem:[#allocation2 + $0x70] sm:$0xff] %v1596_v35 }
 0x254   : > { %v1551_v38 = vpop.f32.mrf.mxu0  ;;  %v1580_v40 = vpop.f32.mrf.mxu1 }
 0x255   : > { %v1597_v41 = vadd.f32 %v1551_v38, %v1423_v36  ;;  %v1598_v37 = vadd.f32 %v1580_v40, %v1424_v30 }
 0x257   : > { %1613 = vst [vmem:[#allocation2 + $0x78] sm:$0xff] %v1597_v41 }
 0x258   : > { %1614 = vst [vmem:[#allocation2 + $0x28] sm:$0xff] %v1598_v37 }
 0x259 PF: > { %s3256_s9 = sld [smem:[#allocation15_spill]]  ;;  %p1616_p4 = scmp.eq.s32.totalorder %s2457_s12, 7 }
 0x25f   : > { %p1615_p3 = scmp.eq.s32.totalorder %s3256_s9, 1 }
 0x261   : > { %p1617_p5 = pnand %p1616_p4, %p1615_p3 }
 0x263   : > { %1620 = sbr.rel (%p1617_p5) target bundleno = 627 (0x273), region = 134 }
 0x268   : > { %v1621_v43 = vld [vmem:[#allocation2 + $0x30] sm:$0xff]  ;;  %v1622_v39 = vld [vmem:[#allocation2] sm:$0xff]  ;;  %v1623_v44 = vld [vmem:[#allocation2 + $0x58] sm:$0xff] }
 0x269   : > { %v1637_v45 = vpack.c.bf16 %v1622_v39, %v1621_v43  ;;  %v1624_v46 = vld [vmem:[#allocation2 + $0x18] sm:$0xff]  ;;  %v1625_v49 = vld [vmem:[#allocation2 + $0x50] sm:$0xff]  ;;  %v1626_v50 = vld [vmem:[#allocation2 + $0x68] sm:$0xff] }
 0x26a   : > { %v1638_v51 = vpack.c.bf16 %v1624_v46, %v1623_v44  ;;  %v1639_v52 = vpack.c.bf16 %v1626_v50, %v1625_v49  ;;  %v1627_v54 = vld [vmem:[#allocation2 + $0x8] sm:$0xff]  ;;  %v1629_v57 = vld [vmem:[#allocation2 + $0x40] sm:$0xff]  ;;  %v1631_v59 = vld [vmem:[#allocation2 + $0x10] sm:$0xff] }
 0x26b   : > { %v1628_v42 = vld [vmem:[#allocation2 + $0x48] sm:$0xff]  ;;  %1645 = vst [vmem:[%s2865_s22] sm:$0xff] %v1637_v45  ;;  %v1630_v53 = vld [vmem:[#allocation2 + $0x20] sm:$0xff]  ;;  %v1632_v60 = vld [vmem:[#allocation2 + $0x38] sm:$0xff] }
 0x26c   : > { %v1640_v58 = vpack.c.bf16 %v1628_v42, %v1627_v54  ;;  %1646 = vst [vmem:[%s2865_s22 + $0x8] sm:$0xff] %v1638_v51  ;;  %v1641_v10 = vpack.c.bf16 %v1630_v53, %v1629_v57  ;;  %v1642_v61 = vpack.c.bf16 %v1632_v60, %v1631_v59  ;;  %v1633_v62 = vld [vmem:[#allocation2 + $0x60] sm:$0xff]  ;;  %v1634_v63 = vld [vmem:[#allocation2 + $0x70] sm:$0xff]  ;;  %v1635_v0 = vld [vmem:[#allocation2 + $0x78] sm:$0xff] }
 0x26d   : > { %1647 = vst [vmem:[%s2865_s22 + $0x10] sm:$0xff] %v1639_v52  ;;  %v1643_v48 = vpack.c.bf16 %v1634_v63, %v1633_v62  ;;  %v1636_v1 = vld [vmem:[#allocation2 + $0x28] sm:$0xff] }
 0x26e   : > { %1648 = vst [vmem:[%s2865_s22 + $0x18] sm:$0xff] %v1640_v58  ;;  %v1644_v55 = vpack.c.bf16 %v1636_v1, %v1635_v0 }
 0x26f   : > { %1649 = vst [vmem:[%s2865_s22 + $0x20] sm:$0xff] %v1641_v10 }
 0x270   : > { %1650 = vst [vmem:[%s2865_s22 + $0x28] sm:$0xff] %v1642_v61 }
 0x271   : > { %1651 = vst [vmem:[%s2865_s22 + $0x30] sm:$0xff] %v1643_v48 }
 0x272   : > { %1652 = vst [vmem:[%s2865_s22 + $0x38] sm:$0xff] %v1644_v55 }
 0x273 PF: > { %s2149_s0 = sshll.u32 %s2465_s14, 6  ;;  %s3257_s15 = sld [smem:[#allocation31_spill]] }
 0x274   : > { %s1667_s17 = sshll.u32 %s2865_s22, 4  ;;  %s3259_s3 = sand.u32 1, %s2433_s8   ;;  %s1668_s17 = int_to_ptr.vmem [resolvable:$true] %s1667_s17 }
 0x275   : > { %s1654_s6 = scalar_lea.sflag [#allocation9], %s3259_s3 }
 0x279   : > { %s3258_s21 = smov %s3257_s15  ;;  %s1666_s16 = scalar_lea.hbm %s3257_s15, %s2149_s0 }
 0x27a   : > { %s1669_s7 = sshll.u32 %s1666_s16, 4  ;;  %s2357_s14 = scalar_lea.hbm %s3258_s21, 128  ;;  %s1670_s7 = int_to_ptr.hbm [resolvable:$true] %s1669_s7 }
 0x27b   : > { %s2351_s27 = sshra.s32 %s1670_s7, 4  ;;  %s2352_s27 = int_to_ptr.hbm [resolvable:$true] %s2351_s27 }
 0x27c   : > { %s2353_s28 = scalar_lea.hbm %s2352_s27, 64  ;;  %p2358_p9 = scmp.lt.s32.totalorder %s2352_s27, %s3258_s21 }
 0x27d   : > { %p2354_p6 = scmp.ne.s32.totalorder %s2352_s27, %s2353_s28  ;;  %p2359_p10 = scmp.lt.s32.totalorder %s2357_s14, %s2353_s28 }
 0x27f   : > { %p2355_p7 = pnand %p2354_p6, %p2660_p0  ;;  %p2360_p11 = por %p2359_p10, %p2358_p9 }
 0x281   : > { %p2356_p8 = pneg %p2355_p7 }
 0x283   : > { %p2361_p12 = pnand %p2360_p11, %p2356_p8 }
 0x285   : > { %2364 = shalt.err (!%p2361_p12)
}
 0x286   : > { %s2486_s26 = smov 128   ;;  %s2487_s4 = smov 8  }
 0x287   : > { %2166 = dma.vmem_to_hbm [thread:$0]  (%p2660_p0), %s1668_s17, 1024, %s1670_s7, %s1654_s6, %s2486_s26, %s2486_s26, %s2487_s4  }
 0x288 PF: > { %p2172_p13 = scmp.ge.s32.totalorder %s2481_s18, 2  ;;  %s1684_s24 = sand.u32 1, %s2429_s30  }
 0x289   : > { %s1685_s13 = scalar_lea.sflag [#allocation9], %s1684_s24 }
 0x28a   : > { %p2169_p1 = pnand %p2172_p13, %p2666_p2 }
 0x28c   : > { %p2170_p3 = pneg %p2169_p1 }
 0x28e   : > { %2424 = dma.done.wait (%p2170_p3), %s1685_s13, 1024  }
 0x28f   : > { %2426 = vsyncadd (%p2170_p3), %s1685_s13, 4294966272  ;;  %s29_s18 = sadd.s32 1, %s2481_s18   ;;  %s3262_s25 = sld [smem:[#allocation12_spill]] }
 0x290   : > { %p3149_p4 = scmp.ge.s32.totalorder %s29_s18, 34   ;;  %s3263_s9 = sld [smem:[#allocation23_spill]] }
 0x291   : > { %s3264_s10 = sld [smem:[#allocation13_spill]]  ;;  %s3275_s30 = smov %s2433_s8 }
 0x292   : > { %s3265_s0 = sld [smem:[#allocation24_spill]] }
 0x293   : > { %s3266_s29 = sld [smem:[#allocation14_spill]] }
 0x294   : > { %s3267_s1 = sld [smem:[#allocation22_spill]] }
 0x295   : > { %s3268_s12 = sld [smem:[#allocation16_spill]]  ;;  %s3276_s8 = smov %s3262_s25 }
 0x296   : > { %s3269_s13 = sld [smem:[#allocation17_spill]]  ;;  %28 = sbr.rel (!%p3149_p4) target bundleno = 20 (0x14), region = 191 }
 0x297   : > { %s3270_s14 = sld [smem:[#allocation18_spill]] }
 0x298   : > { %s3271_s15 = sld [smem:[#allocation19_spill]] }
 0x299   : > { %s3272_s16 = sld [smem:[#allocation20_spill]]  ;;  %s3277_s11 = smov %s3266_s29 }
 0x29a   : > { %s3273_s17 = sld [smem:[#allocation21_spill]] }
 0x29b   :  { %1691 = vsyncpa [#allocation9], 1 }
 0x29c   :  { %1693 = vsyncpa [#allocation9 + $0x1], 1 }

</bundles_post_ra>
